<compile_context>
chip_gen: v7x
topology: tpu7x:2x2x1
jax: 0.10.0
libtpu: 0.0.40
codegen_flags: <defaults>
</compile_context>

<pallas_src>
import math

import jax
import jax.numpy as jnp
from jax import lax
from jax.experimental import pallas as pl
from jax.experimental.pallas import tpu as pltpu

EMB_DIMS = 32
BN_EPS = 1e-5
# pointer == Identity => embedding := embedding + embedding == 2 * embedding.
# scores = (2 src_e).(2 tgt_e)/sqrt(d_k) = SCORE_SCALE * (src_e . tgt_e).
SCORE_SCALE = 4.0 / math.sqrt(EMB_DIMS)
# sqrt(SCORE_SCALE) is folded into the LAST PointNet layer (positive gain
# commutes with ReLU), so no N^2 score scaling happens inside the kernel.
EMB_GAIN = math.sqrt(SCORE_SCALE)
# Softmax exp dtype.  f32 is safe on every TPU generation (v5e EUP is
# f32-only).  On v6e / v7x set this to jnp.bfloat16 for ~2x EUP throughput on
# the dominant N^2 exp stream (e is cast to bf16 for the MXU either way).
SOFTMAX_EXP_DTYPE = jnp.float32


# ----------------------------------------------------------------------------
# Fused kernel: PointNet embedding + scores + online softmax + soft
# correspondence + means + 3x3 covariance H, per (batch, tgt-chunk) grid step.
# ----------------------------------------------------------------------------
# TODO(synk): for very large N (>~8K) also tile the source axis (scores_T is
# (Tj, N) f32 per step); not needed for typical DCP point counts.
def _dcp_kernel(src_ref, tgt_ref,
                w1, w2, w3, w4, w5,
                b1, b2, b3, b4, b5,
                corr_ref, stats_ref,
                src_e_scr, m_scr, acc_scr):
    j = pl.program_id(1)
    layers = ((w1, b1), (w2, b2), (w3, b3), (w4, b4), (w5, b5))

    def pointnet(pts):
        # pts: (3, T) f32 -> (EMB_DIMS, T) bf16.  1x1 Conv1d == channel matmul;
        # BN scale pre-folded into W, so only shift + ReLU remain per layer.
        h = pts.astype(jnp.bfloat16)
        for w, b in layers:
            z = jnp.dot(w[...], h, preferred_element_type=jnp.float32)  # (Cout, T)
            h = jnp.maximum(z + b[...], 0.0).astype(jnp.bfloat16)
        return h

    @pl.when(j == 0)
    def _():
        # Embed the full source cloud once per batch element; cache in VMEM.
        src_e_scr[...] = pointnet(src_ref[0])                # (E, N) bf16
        m_scr[...] = jnp.full_like(m_scr, -jnp.inf)
        acc_scr[...] = jnp.zeros_like(acc_scr)

    tgt_aug = tgt_ref[0]                                     # (4, Tj): xyz + ones row
    tgt_e = pointnet(tgt_aug[0:3, :])                        # (E, Tj) bf16

    # scores_T[jj, ii] = <tgt_e[:, jj], src_e[:, ii]>  (scale folded into layer 5).
    scores_t = lax.dot_general(tgt_e, src_e_scr[...], (((0,), (0,)), ((), ())),
                               preferred_element_type=jnp.float32)     # (Tj, N)

    # Online softmax over the target axis == sublane axis here (cheap VALU reduce).
    blk_max = jnp.max(scores_t, axis=0, keepdims=True)                 # (1, N)
    m_new = jnp.maximum(m_scr[...], blk_max)
    alpha = jnp.exp(m_scr[...] - m_new)                                # (1, N)
    e_t = jnp.exp((scores_t - m_new).astype(SOFTMAX_EXP_DTYPE))
    e_t = e_t.astype(jnp.bfloat16)                                     # (Tj, N)

    # One matmul accumulates both the unnormalized correspondence (rows 0..2)
    # and the softmax row-sums (row 3), in the natural (M,K)@(K,N) orientation.
    contrib = lax.dot_general(tgt_aug.astype(jnp.bfloat16), e_t,
                              (((1,), (0,)), ((), ())),
                              preferred_element_type=jnp.float32)      # (4, N)
    acc_scr[...] = acc_scr[...] * alpha + contrib
    m_scr[...] = m_new

    @pl.when(j == pl.num_programs(1) - 1)
    def _():
        acc = acc_scr[...]
        inv = pl.reciprocal(acc[3:4, :], approx=True)                  # (1, N) EUP
        corr = acc[0:3, :] * inv                                       # (3, N) lane-dense
        corr_ref[0] = corr.astype(corr_ref.dtype)

        src_p = src_ref[0]                                             # (3, N) f32
        src_mean = jnp.mean(src_p, axis=1, keepdims=True)              # (3, 1)
        corr_mean = jnp.mean(corr, axis=1, keepdims=True)              # (3, 1)
        src_c = src_p - src_mean
        corr_c = corr - corr_mean
        # H[a, b] = sum_i src_c[a, i] * corr_c[b, i]
        H = lax.dot_general(src_c, corr_c, (((1,), (1,)), ((), ())),
                            preferred_element_type=jnp.float32)        # (3, 3)
        # Pack H | src_mean | corr_mean into one tiny per-batch output (the
        # lane dim of 5 causes a masked partial store, harmless at this size).
        stats_ref[0] = jnp.concatenate([H, src_mean, corr_mean], axis=1)


def _pick_tgt_tile(n, max_tile=512):
    """Largest lane-aligned tile <= max_tile that divides n (or n itself)."""
    if n <= max_tile:
        return n
    for t in range(max_tile, 127, -128):
        if n % t == 0:
            return t
    return n  # fallback: whole target axis resident (no chunking)


def dcp_core(src, tgt_aug, weights, shifts):
    """src: (B, 3, N) f32; tgt_aug: (B, 4, N) f32 (xyz + ones row).
    Returns (src_corr (B,3,N) f32, stats (B,3,5) f32 = [H | src_mean | corr_mean])."""
    b, _, n = src.shape
    tj = _pick_tgt_tile(n)
    grid = (b, n // tj)
    w_specs = [pl.BlockSpec(w.shape, lambda i, j: (0, 0)) for w in weights]
    b_specs = [pl.BlockSpec(s.shape, lambda i, j: (0, 0)) for s in shifts]
    return pl.pallas_call(
        _dcp_kernel,
        out_shape=(
            jax.ShapeDtypeStruct((b, 3, n), jnp.float32),   # src_corr
            jax.ShapeDtypeStruct((b, 3, 5), jnp.float32),   # [H | src_mean | corr_mean]
        ),
        grid=grid,
        in_specs=[pl.BlockSpec((1, 3, n), lambda i, j: (i, 0, 0)),     # src (resident per i)
                  pl.BlockSpec((1, 4, tj), lambda i, j: (i, 0, j))]    # tgt chunk (pipelined)
                 + w_specs + b_specs,
        out_specs=(
            pl.BlockSpec((1, 3, n), lambda i, j: (i, 0, 0)),
            pl.BlockSpec((1, 3, 5), lambda i, j: (i, 0, 0)),
        ),
        scratch_shapes=[
            pltpu.VMEM((EMB_DIMS, n), jnp.bfloat16),   # cached source embedding
            pltpu.VMEM((1, n), jnp.float32),           # running softmax max
            pltpu.VMEM((4, n), jnp.float32),           # corr (3 rows) + row-sum (1 row)
        ],
        compiler_params=pltpu.CompilerParams(
            dimension_semantics=("parallel", "arbitrary")),
    )(src, tgt_aug, *weights, *shifts)


# ----------------------------------------------------------------------------
# Plain-JAX glue: batched 3x3 SVD (Kabsch), reflection fix, t, cycle=False.
# ----------------------------------------------------------------------------
# TODO(synk): batched 3x3 torch.svd/torch.det have no clean Pallas equivalent;
# done with jnp.linalg on the (B, 3, 3) covariances (negligible work).
def _svd_rt(H, src_mean, corr_mean):
    u, s, vh = jnp.linalg.svd(H)
    v = jnp.swapaxes(vh, -1, -2)
    ut = jnp.swapaxes(u, -1, -2)
    r = jnp.matmul(v, ut)
    det = jnp.linalg.det(r)
    reflect = jnp.diag(jnp.array([1.0, 1.0, -1.0], dtype=jnp.float32))
    r_fix = jnp.matmul(jnp.matmul(v, reflect), ut)
    R = jnp.where(det[:, None, None] < 0, r_fix, r)
    t = -jnp.einsum('bij,bj->bi', R, src_mean) + corr_mean
    return R, t


def dcp_forward(src, tgt, params):
    """src, tgt: (B, 3, N) float32 (PyTorch channel-major layout)."""
    weights, shifts = params
    b, _, n = src.shape

    # Pre-append the ones row (row-sum trick) in the wrapper: (B, 4, N).
    tgt_aug = jnp.concatenate([tgt, jnp.ones((b, 1, n), jnp.float32)], axis=1)

    corr, stats = dcp_core(src, tgt_aug, weights, shifts)   # (B,3,N), (B,3,5)
    H = stats[:, :, 0:3]
    src_mean = stats[:, :, 3]
    corr_mean = stats[:, :, 4]

    rotation_ab, translation_ab = _svd_rt(H, src_mean, corr_mean)

    # cycle == False branch
    rotation_ba = jnp.swapaxes(rotation_ab, 1, 2)
    translation_ba = -jnp.einsum('bij,bj->bi', rotation_ba, translation_ab)

    return (rotation_ab, translation_ab, rotation_ba, translation_ba,
            src, corr)


# ----------------------------------------------------------------------------
# Deterministic parameter init: Conv1d weights with eval-mode BN scale folded
# in (W' = scale ⊙ W, exact in f32 before the bf16 cast); last layer also gets
# the sqrt(SCORE_SCALE) gain.  Shifts kept as (Cout, 1) f32.
# ----------------------------------------------------------------------------
def init_pointnet_params(key, emb_dims=EMB_DIMS):
    chans = [3, 64, 64, 64, 128, emb_dims]
    weights, shifts = [], []
    for i in range(5):
        key, k1, k2, k3, k4, k5 = jax.random.split(key, 6)
        cin, cout = chans[i], chans[i + 1]
        w = jax.random.normal(k1, (cout, cin), jnp.float32) / math.sqrt(cin)
        gamma = 1.0 + 0.1 * jax.random.normal(k2, (cout,), jnp.float32)
        beta = 0.1 * jax.random.normal(k3, (cout,), jnp.float32)
        r_mean = 0.1 * jax.random.normal(k4, (cout,), jnp.float32)
        r_var = jnp.abs(jax.random.normal(k5, (cout,), jnp.float32)) + 0.5
        scale = gamma / jnp.sqrt(r_var + BN_EPS)
        shift = beta - r_mean * scale
        w_folded = w * scale[:, None]          # fold BN scale into the weight
        if i == 4:
            # Fold pointer==Identity doubling and 1/sqrt(d_k): positive gain
            # commutes with ReLU, so scale both the weight and the shift.
            w_folded = w_folded * EMB_GAIN
            shift = shift * EMB_GAIN
        weights.append(w_folded.astype(jnp.bfloat16))
        shifts.append(shift.reshape(cout, 1))
    return weights, shifts


if __name__ == "__main__":
    key = jax.random.PRNGKey(0)
    kp, ksrc, ktgt = jax.random.split(key, 3)

    B, N = 2, 16
    params = init_pointnet_params(kp)
    src = jax.random.normal(ksrc, (B, 3, N), jnp.float32)
    tgt = jax.random.normal(ktgt, (B, 3, N), jnp.float32)

    outs = dcp_forward(src, tgt, params)
    outs = jax.block_until_ready(outs)

    R_ab, t_ab, R_ba, t_ba, src_out, src_corr = outs
    assert R_ab.shape == (B, 3, 3) and t_ab.shape == (B, 3)
    assert R_ba.shape == (B, 3, 3) and t_ba.shape == (B, 3)
    assert src_out.shape == (B, 3, N) and src_corr.shape == (B, 3, N)
    assert bool(jnp.all(jnp.isfinite(R_ab))) and bool(jnp.all(jnp.isfinite(t_ab)))
    assert bool(jnp.all(jnp.isfinite(src_corr)))
    # R must be a proper rotation.
    eye = jnp.broadcast_to(jnp.eye(3, dtype=jnp.float32), (B, 3, 3))
    assert bool(jnp.allclose(jnp.matmul(R_ab, jnp.swapaxes(R_ab, 1, 2)), eye,
                             atol=1e-2))
    print("KERNEL_OK")
</pallas_src>

<mosaic_0001>
module attributes {stable_mosaic.version = 11 : i64} {
  func.func @_dcp_kernel(%arg0: i32, %arg1: i32, %arg2: memref<1x3x16xf32, #tpu.memory_space<vmem>>, %arg3: memref<1x4x16xf32, #tpu.memory_space<vmem>>, %arg4: memref<64x3xbf16, #tpu.memory_space<vmem>>, %arg5: memref<64x64xbf16, #tpu.memory_space<vmem>>, %arg6: memref<64x64xbf16, #tpu.memory_space<vmem>>, %arg7: memref<128x64xbf16, #tpu.memory_space<vmem>>, %arg8: memref<32x128xbf16, #tpu.memory_space<vmem>>, %arg9: memref<64x1xf32, #tpu.memory_space<vmem>>, %arg10: memref<64x1xf32, #tpu.memory_space<vmem>>, %arg11: memref<64x1xf32, #tpu.memory_space<vmem>>, %arg12: memref<128x1xf32, #tpu.memory_space<vmem>>, %arg13: memref<32x1xf32, #tpu.memory_space<vmem>>, %arg14: memref<1x3x16xf32, #tpu.memory_space<vmem>>, %arg15: memref<1x3x5xf32, #tpu.memory_space<vmem>>, %arg16: memref<32x16xbf16, #tpu.memory_space<vmem>>, %arg17: memref<1x16xf32, #tpu.memory_space<vmem>>, %arg18: memref<4x16xf32, #tpu.memory_space<vmem>>) attributes {dimension_semantics = [#tpu.dimension_semantics<parallel>, #tpu.dimension_semantics<arbitrary>], iteration_bounds = array<i64: 2, 1>, scalar_prefetch = 0 : i64, scratch_operands = 3 : i64, tpu.core_type = #tpu.core_type<tc>, window_params = [{transform_indices = @transform_0, window_bounds = array<i64: 1, 3, 16>}, {transform_indices = @transform_1, window_bounds = array<i64: 1, 4, 16>}, {pipeline_mode = #tpu.pipeline_mode<synchronous>, transform_indices = @transform_2, window_bounds = array<i64: 64, 3>}, {pipeline_mode = #tpu.pipeline_mode<synchronous>, transform_indices = @transform_3, window_bounds = array<i64: 64, 64>}, {pipeline_mode = #tpu.pipeline_mode<synchronous>, transform_indices = @transform_4, window_bounds = array<i64: 64, 64>}, {pipeline_mode = #tpu.pipeline_mode<synchronous>, transform_indices = @transform_5, window_bounds = array<i64: 128, 64>}, {pipeline_mode = #tpu.pipeline_mode<synchronous>, transform_indices = @transform_6, window_bounds = array<i64: 32, 128>}, {pipeline_mode = #tpu.pipeline_mode<synchronous>, transform_indices = @transform_7, window_bounds = array<i64: 64, 1>}, {pipeline_mode = #tpu.pipeline_mode<synchronous>, transform_indices = @transform_8, window_bounds = array<i64: 64, 1>}, {pipeline_mode = #tpu.pipeline_mode<synchronous>, transform_indices = @transform_9, window_bounds = array<i64: 64, 1>}, {pipeline_mode = #tpu.pipeline_mode<synchronous>, transform_indices = @transform_10, window_bounds = array<i64: 128, 1>}, {pipeline_mode = #tpu.pipeline_mode<synchronous>, transform_indices = @transform_11, window_bounds = array<i64: 32, 1>}, {transform_indices = @transform_12, window_bounds = array<i64: 1, 3, 16>}, {transform_indices = @transform_13, window_bounds = array<i64: 1, 3, 5>}]} {
    %c0_i32 = arith.constant 0 : i32
    %0 = arith.cmpi eq, %arg1, %c0_i32 : i32
    %1 = arith.extui %0 : i1 to i32
    %c0_i32_0 = arith.constant 0 : i32
    %2 = arith.cmpi ne, %1, %c0_i32_0 : i32
    scf.if %2 {
      %c0_49 = arith.constant 0 : index
      %c0_50 = arith.constant 0 : index
      %c0_51 = arith.constant 0 : index
      %71 = vector.load %arg2[%c0_49, %c0_50, %c0_51] : memref<1x3x16xf32, #tpu.memory_space<vmem>>, vector<1x3x16xf32>
      %72 = vector.shape_cast %71 : vector<1x3x16xf32> to vector<3x16xf32>
      %73 = arith.truncf %72 : vector<3x16xf32> to vector<3x16xbf16>
      %c0_52 = arith.constant 0 : index
      %c0_53 = arith.constant 0 : index
      %74 = vector.load %arg4[%c0_52, %c0_53] : memref<64x3xbf16, #tpu.memory_space<vmem>>, vector<64x3xbf16>
      %cst_54 = arith.constant dense<0.000000e+00> : vector<64x16xf32>
      %75 = tpu.matmul %74, %73, %cst_54 {dimension_numbers = #tpu.dot_dimension_numbers<[1], [0], [0], [1], [0, 0, 1, 1], [], []>} : vector<64x3xbf16>, vector<3x16xbf16>, vector<64x16xf32> -> vector<64x16xf32>
      %c0_55 = arith.constant 0 : index
      %c0_56 = arith.constant 0 : index
      %76 = vector.load %arg9[%c0_55, %c0_56] : memref<64x1xf32, #tpu.memory_space<vmem>>, vector<64x1xf32>
      %77 = vector.broadcast %76 : vector<64x1xf32> to vector<64x16xf32>
      %78 = arith.addf %75, %77 : vector<64x16xf32>
      %cst_57 = arith.constant 0.000000e+00 : f32
      %79 = vector.broadcast %cst_57 : f32 to vector<64x16xf32>
      %80 = arith.maximumf %78, %79 : vector<64x16xf32>
      %81 = arith.truncf %80 : vector<64x16xf32> to vector<64x16xbf16>
      %c0_58 = arith.constant 0 : index
      %c0_59 = arith.constant 0 : index
      %82 = vector.load %arg5[%c0_58, %c0_59] : memref<64x64xbf16, #tpu.memory_space<vmem>>, vector<64x64xbf16>
      %cst_60 = arith.constant dense<0.000000e+00> : vector<64x16xf32>
      %83 = tpu.matmul %82, %81, %cst_60 {dimension_numbers = #tpu.dot_dimension_numbers<[1], [0], [0], [1], [0, 0, 1, 1], [], []>} : vector<64x64xbf16>, vector<64x16xbf16>, vector<64x16xf32> -> vector<64x16xf32>
      %c0_61 = arith.constant 0 : index
      %c0_62 = arith.constant 0 : index
      %84 = vector.load %arg10[%c0_61, %c0_62] : memref<64x1xf32, #tpu.memory_space<vmem>>, vector<64x1xf32>
      %85 = vector.broadcast %84 : vector<64x1xf32> to vector<64x16xf32>
      %86 = arith.addf %83, %85 : vector<64x16xf32>
      %cst_63 = arith.constant 0.000000e+00 : f32
      %87 = vector.broadcast %cst_63 : f32 to vector<64x16xf32>
      %88 = arith.maximumf %86, %87 : vector<64x16xf32>
      %89 = arith.truncf %88 : vector<64x16xf32> to vector<64x16xbf16>
      %c0_64 = arith.constant 0 : index
      %c0_65 = arith.constant 0 : index
      %90 = vector.load %arg6[%c0_64, %c0_65] : memref<64x64xbf16, #tpu.memory_space<vmem>>, vector<64x64xbf16>
      %cst_66 = arith.constant dense<0.000000e+00> : vector<64x16xf32>
      %91 = tpu.matmul %90, %89, %cst_66 {dimension_numbers = #tpu.dot_dimension_numbers<[1], [0], [0], [1], [0, 0, 1, 1], [], []>} : vector<64x64xbf16>, vector<64x16xbf16>, vector<64x16xf32> -> vector<64x16xf32>
      %c0_67 = arith.constant 0 : index
      %c0_68 = arith.constant 0 : index
      %92 = vector.load %arg11[%c0_67, %c0_68] : memref<64x1xf32, #tpu.memory_space<vmem>>, vector<64x1xf32>
      %93 = vector.broadcast %92 : vector<64x1xf32> to vector<64x16xf32>
      %94 = arith.addf %91, %93 : vector<64x16xf32>
      %cst_69 = arith.constant 0.000000e+00 : f32
      %95 = vector.broadcast %cst_69 : f32 to vector<64x16xf32>
      %96 = arith.maximumf %94, %95 : vector<64x16xf32>
      %97 = arith.truncf %96 : vector<64x16xf32> to vector<64x16xbf16>
      %c0_70 = arith.constant 0 : index
      %c0_71 = arith.constant 0 : index
      %98 = vector.load %arg7[%c0_70, %c0_71] : memref<128x64xbf16, #tpu.memory_space<vmem>>, vector<128x64xbf16>
      %cst_72 = arith.constant dense<0.000000e+00> : vector<128x16xf32>
      %99 = tpu.matmul %98, %97, %cst_72 {dimension_numbers = #tpu.dot_dimension_numbers<[1], [0], [0], [1], [0, 0, 1, 1], [], []>} : vector<128x64xbf16>, vector<64x16xbf16>, vector<128x16xf32> -> vector<128x16xf32>
      %c0_73 = arith.constant 0 : index
      %c0_74 = arith.constant 0 : index
      %100 = vector.load %arg12[%c0_73, %c0_74] : memref<128x1xf32, #tpu.memory_space<vmem>>, vector<128x1xf32>
      %101 = vector.broadcast %100 : vector<128x1xf32> to vector<128x16xf32>
      %102 = arith.addf %99, %101 : vector<128x16xf32>
      %cst_75 = arith.constant 0.000000e+00 : f32
      %103 = vector.broadcast %cst_75 : f32 to vector<128x16xf32>
      %104 = arith.maximumf %102, %103 : vector<128x16xf32>
      %105 = arith.truncf %104 : vector<128x16xf32> to vector<128x16xbf16>
      %c0_76 = arith.constant 0 : index
      %c0_77 = arith.constant 0 : index
      %106 = vector.load %arg8[%c0_76, %c0_77] : memref<32x128xbf16, #tpu.memory_space<vmem>>, vector<32x128xbf16>
      %cst_78 = arith.constant dense<0.000000e+00> : vector<32x16xf32>
      %107 = tpu.matmul %106, %105, %cst_78 {dimension_numbers = #tpu.dot_dimension_numbers<[1], [0], [0], [1], [0, 0, 1, 1], [], []>} : vector<32x128xbf16>, vector<128x16xbf16>, vector<32x16xf32> -> vector<32x16xf32>
      %c0_79 = arith.constant 0 : index
      %c0_80 = arith.constant 0 : index
      %108 = vector.load %arg13[%c0_79, %c0_80] : memref<32x1xf32, #tpu.memory_space<vmem>>, vector<32x1xf32>
      %109 = vector.broadcast %108 : vector<32x1xf32> to vector<32x16xf32>
      %110 = arith.addf %107, %109 : vector<32x16xf32>
      %cst_81 = arith.constant 0.000000e+00 : f32
      %111 = vector.broadcast %cst_81 : f32 to vector<32x16xf32>
      %112 = arith.maximumf %110, %111 : vector<32x16xf32>
      %113 = arith.truncf %112 : vector<32x16xf32> to vector<32x16xbf16>
      %c0_82 = arith.constant 0 : index
      %c0_83 = arith.constant 0 : index
      %114 = vector.load %arg16[%c0_82, %c0_83] : memref<32x16xbf16, #tpu.memory_space<vmem>>, vector<32x16xbf16>
      tpu.vector_store %arg16[%c0_82, %c0_83], %113 {strides = array<i32>} : memref<32x16xbf16, #tpu.memory_space<vmem>>, vector<32x16xbf16>,
      %cst_84 = arith.constant 0xFF800000 : f32
      %115 = vector.broadcast %cst_84 : f32 to vector<1x16xf32>
      %c0_85 = arith.constant 0 : index
      %c0_86 = arith.constant 0 : index
      %116 = vector.load %arg17[%c0_85, %c0_86] : memref<1x16xf32, #tpu.memory_space<vmem>>, vector<1x16xf32>
      tpu.vector_store %arg17[%c0_85, %c0_86], %115 {strides = array<i32>} : memref<1x16xf32, #tpu.memory_space<vmem>>, vector<1x16xf32>,
      %cst_87 = arith.constant 0.000000e+00 : f32
      %117 = vector.broadcast %cst_87 : f32 to vector<4x16xf32>
      %c0_88 = arith.constant 0 : index
      %c0_89 = arith.constant 0 : index
      %118 = vector.load %arg18[%c0_88, %c0_89] : memref<4x16xf32, #tpu.memory_space<vmem>>, vector<4x16xf32>
      tpu.vector_store %arg18[%c0_88, %c0_89], %117 {strides = array<i32>} : memref<4x16xf32, #tpu.memory_space<vmem>>, vector<4x16xf32>,
    } else {
    }
    %c0 = arith.constant 0 : index
    %c0_1 = arith.constant 0 : index
    %c0_2 = arith.constant 0 : index
    %3 = vector.load %arg3[%c0, %c0_1, %c0_2] : memref<1x4x16xf32, #tpu.memory_space<vmem>>, vector<1x4x16xf32>
    %4 = vector.shape_cast %3 : vector<1x4x16xf32> to vector<4x16xf32>
    %5 = vector.extract_strided_slice %4 {offsets = [0, 0], sizes = [3, 16], strides = [1, 1]} : vector<4x16xf32> to vector<3x16xf32>
    %6 = arith.truncf %5 : vector<3x16xf32> to vector<3x16xbf16>
    %c0_3 = arith.constant 0 : index
    %c0_4 = arith.constant 0 : index
    %7 = vector.load %arg4[%c0_3, %c0_4] : memref<64x3xbf16, #tpu.memory_space<vmem>>, vector<64x3xbf16>
    %cst = arith.constant dense<0.000000e+00> : vector<64x16xf32>
    %8 = tpu.matmul %7, %6, %cst {dimension_numbers = #tpu.dot_dimension_numbers<[1], [0], [0], [1], [0, 0, 1, 1], [], []>} : vector<64x3xbf16>, vector<3x16xbf16>, vector<64x16xf32> -> vector<64x16xf32>
    %c0_5 = arith.constant 0 : index
    %c0_6 = arith.constant 0 : index
    %9 = vector.load %arg9[%c0_5, %c0_6] : memref<64x1xf32, #tpu.memory_space<vmem>>, vector<64x1xf32>
    %10 = vector.broadcast %9 : vector<64x1xf32> to vector<64x16xf32>
    %11 = arith.addf %8, %10 : vector<64x16xf32>
    %cst_7 = arith.constant 0.000000e+00 : f32
    %12 = vector.broadcast %cst_7 : f32 to vector<64x16xf32>
    %13 = arith.maximumf %11, %12 : vector<64x16xf32>
    %14 = arith.truncf %13 : vector<64x16xf32> to vector<64x16xbf16>
    %c0_8 = arith.constant 0 : index
    %c0_9 = arith.constant 0 : index
    %15 = vector.load %arg5[%c0_8, %c0_9] : memref<64x64xbf16, #tpu.memory_space<vmem>>, vector<64x64xbf16>
    %cst_10 = arith.constant dense<0.000000e+00> : vector<64x16xf32>
    %16 = tpu.matmul %15, %14, %cst_10 {dimension_numbers = #tpu.dot_dimension_numbers<[1], [0], [0], [1], [0, 0, 1, 1], [], []>} : vector<64x64xbf16>, vector<64x16xbf16>, vector<64x16xf32> -> vector<64x16xf32>
    %c0_11 = arith.constant 0 : index
    %c0_12 = arith.constant 0 : index
    %17 = vector.load %arg10[%c0_11, %c0_12] : memref<64x1xf32, #tpu.memory_space<vmem>>, vector<64x1xf32>
    %18 = vector.broadcast %17 : vector<64x1xf32> to vector<64x16xf32>
    %19 = arith.addf %16, %18 : vector<64x16xf32>
    %cst_13 = arith.constant 0.000000e+00 : f32
    %20 = vector.broadcast %cst_13 : f32 to vector<64x16xf32>
    %21 = arith.maximumf %19, %20 : vector<64x16xf32>
    %22 = arith.truncf %21 : vector<64x16xf32> to vector<64x16xbf16>
    %c0_14 = arith.constant 0 : index
    %c0_15 = arith.constant 0 : index
    %23 = vector.load %arg6[%c0_14, %c0_15] : memref<64x64xbf16, #tpu.memory_space<vmem>>, vector<64x64xbf16>
    %cst_16 = arith.constant dense<0.000000e+00> : vector<64x16xf32>
    %24 = tpu.matmul %23, %22, %cst_16 {dimension_numbers = #tpu.dot_dimension_numbers<[1], [0], [0], [1], [0, 0, 1, 1], [], []>} : vector<64x64xbf16>, vector<64x16xbf16>, vector<64x16xf32> -> vector<64x16xf32>
    %c0_17 = arith.constant 0 : index
    %c0_18 = arith.constant 0 : index
    %25 = vector.load %arg11[%c0_17, %c0_18] : memref<64x1xf32, #tpu.memory_space<vmem>>, vector<64x1xf32>
    %26 = vector.broadcast %25 : vector<64x1xf32> to vector<64x16xf32>
    %27 = arith.addf %24, %26 : vector<64x16xf32>
    %cst_19 = arith.constant 0.000000e+00 : f32
    %28 = vector.broadcast %cst_19 : f32 to vector<64x16xf32>
    %29 = arith.maximumf %27, %28 : vector<64x16xf32>
    %30 = arith.truncf %29 : vector<64x16xf32> to vector<64x16xbf16>
    %c0_20 = arith.constant 0 : index
    %c0_21 = arith.constant 0 : index
    %31 = vector.load %arg7[%c0_20, %c0_21] : memref<128x64xbf16, #tpu.memory_space<vmem>>, vector<128x64xbf16>
    %cst_22 = arith.constant dense<0.000000e+00> : vector<128x16xf32>
    %32 = tpu.matmul %31, %30, %cst_22 {dimension_numbers = #tpu.dot_dimension_numbers<[1], [0], [0], [1], [0, 0, 1, 1], [], []>} : vector<128x64xbf16>, vector<64x16xbf16>, vector<128x16xf32> -> vector<128x16xf32>
    %c0_23 = arith.constant 0 : index
    %c0_24 = arith.constant 0 : index
    %33 = vector.load %arg12[%c0_23, %c0_24] : memref<128x1xf32, #tpu.memory_space<vmem>>, vector<128x1xf32>
    %34 = vector.broadcast %33 : vector<128x1xf32> to vector<128x16xf32>
    %35 = arith.addf %32, %34 : vector<128x16xf32>
    %cst_25 = arith.constant 0.000000e+00 : f32
    %36 = vector.broadcast %cst_25 : f32 to vector<128x16xf32>
    %37 = arith.maximumf %35, %36 : vector<128x16xf32>
    %38 = arith.truncf %37 : vector<128x16xf32> to vector<128x16xbf16>
    %c0_26 = arith.constant 0 : index
    %c0_27 = arith.constant 0 : index
    %39 = vector.load %arg8[%c0_26, %c0_27] : memref<32x128xbf16, #tpu.memory_space<vmem>>, vector<32x128xbf16>
    %cst_28 = arith.constant dense<0.000000e+00> : vector<32x16xf32>
    %40 = tpu.matmul %39, %38, %cst_28 {dimension_numbers = #tpu.dot_dimension_numbers<[1], [0], [0], [1], [0, 0, 1, 1], [], []>} : vector<32x128xbf16>, vector<128x16xbf16>, vector<32x16xf32> -> vector<32x16xf32>
    %c0_29 = arith.constant 0 : index
    %c0_30 = arith.constant 0 : index
    %41 = vector.load %arg13[%c0_29, %c0_30] : memref<32x1xf32, #tpu.memory_space<vmem>>, vector<32x1xf32>
    %42 = vector.broadcast %41 : vector<32x1xf32> to vector<32x16xf32>
    %43 = arith.addf %40, %42 : vector<32x16xf32>
    %cst_31 = arith.constant 0.000000e+00 : f32
    %44 = vector.broadcast %cst_31 : f32 to vector<32x16xf32>
    %45 = arith.maximumf %43, %44 : vector<32x16xf32>
    %46 = arith.truncf %45 : vector<32x16xf32> to vector<32x16xbf16>
    %c0_32 = arith.constant 0 : index
    %c0_33 = arith.constant 0 : index
    %47 = vector.load %arg16[%c0_32, %c0_33] : memref<32x16xbf16, #tpu.memory_space<vmem>>, vector<32x16xbf16>
    %cst_34 = arith.constant dense<0.000000e+00> : vector<16x16xf32>
    %48 = tpu.matmul %46, %47, %cst_34 {dimension_numbers = #tpu.dot_dimension_numbers<[0], [0], [1], [1], [0, 1, 1, 1], [], []>} : vector<32x16xbf16>, vector<32x16xbf16>, vector<16x16xf32> -> vector<16x16xf32>
    %cst_35 = arith.constant dense<0xFF800000> : vector<16xf32>
    %49 = vector.multi_reduction <maximumf>, %48, %cst_35 [0] : vector<16x16xf32> to vector<16xf32>
    %50 = vector.shape_cast %49 : vector<16xf32> to vector<1x16xf32>
    %c0_36 = arith.constant 0 : index
    %c0_37 = arith.constant 0 : index
    %51 = vector.load %arg17[%c0_36, %c0_37] : memref<1x16xf32, #tpu.memory_space<vmem>>, vector<1x16xf32>
    %52 = arith.maximumf %51, %50 : vector<1x16xf32>
    %c0_38 = arith.constant 0 : index
    %c0_39 = arith.constant 0 : index
    %53 = vector.load %arg17[%c0_38, %c0_39] : memref<1x16xf32, #tpu.memory_space<vmem>>, vector<1x16xf32>
    %54 = arith.subf %53, %52 : vector<1x16xf32>
    %55 = math.exp %54 : vector<1x16xf32>
    %56 = vector.broadcast %52 : vector<1x16xf32> to vector<16x16xf32>
    %57 = arith.subf %48, %56 : vector<16x16xf32>
    %58 = math.exp %57 : vector<16x16xf32>
    %59 = arith.truncf %58 : vector<16x16xf32> to vector<16x16xbf16>
    %60 = arith.truncf %4 : vector<4x16xf32> to vector<4x16xbf16>
    %cst_40 = arith.constant dense<0.000000e+00> : vector<4x16xf32>
    %61 = tpu.matmul %60, %59, %cst_40 {dimension_numbers = #tpu.dot_dimension_numbers<[1], [0], [0], [1], [0, 0, 1, 1], [], []>} : vector<4x16xbf16>, vector<16x16xbf16>, vector<4x16xf32> -> vector<4x16xf32>
    %c0_41 = arith.constant 0 : index
    %c0_42 = arith.constant 0 : index
    %62 = vector.load %arg18[%c0_41, %c0_42] : memref<4x16xf32, #tpu.memory_space<vmem>>, vector<4x16xf32>
    %63 = vector.broadcast %55 : vector<1x16xf32> to vector<4x16xf32>
    %64 = arith.mulf %62, %63 : vector<4x16xf32>
    %65 = arith.addf %64, %61 : vector<4x16xf32>
    %c0_43 = arith.constant 0 : index
    %c0_44 = arith.constant 0 : index
    %66 = vector.load %arg18[%c0_43, %c0_44] : memref<4x16xf32, #tpu.memory_space<vmem>>, vector<4x16xf32>
    tpu.vector_store %arg18[%c0_43, %c0_44], %65 {strides = array<i32>} : memref<4x16xf32, #tpu.memory_space<vmem>>, vector<4x16xf32>,
    %c0_45 = arith.constant 0 : index
    %c0_46 = arith.constant 0 : index
    %67 = vector.load %arg17[%c0_45, %c0_46] : memref<1x16xf32, #tpu.memory_space<vmem>>, vector<1x16xf32>
    tpu.vector_store %arg17[%c0_45, %c0_46], %52 {strides = array<i32>} : memref<1x16xf32, #tpu.memory_space<vmem>>, vector<1x16xf32>,
    %c0_i32_47 = arith.constant 0 : i32
    %68 = arith.cmpi eq, %arg1, %c0_i32_47 : i32
    %69 = arith.extui %68 : i1 to i32
    %c0_i32_48 = arith.constant 0 : i32
    %70 = arith.cmpi ne, %69, %c0_i32_48 : i32
    scf.if %70 {
      %c0_49 = arith.constant 0 : index
      %c0_50 = arith.constant 0 : index
      %71 = vector.load %arg18[%c0_49, %c0_50] : memref<4x16xf32, #tpu.memory_space<vmem>>, vector<4x16xf32>
      %72 = vector.extract_strided_slice %71 {offsets = [3, 0], sizes = [1, 16], strides = [1, 1]} : vector<4x16xf32> to vector<1x16xf32>
      %73 = tpu.reciprocal %72 {approx = true} : vector<1x16xf32> -> vector<1x16xf32>
      %74 = vector.extract_strided_slice %71 {offsets = [0, 0], sizes = [3, 16], strides = [1, 1]} : vector<4x16xf32> to vector<3x16xf32>
      %75 = vector.broadcast %73 : vector<1x16xf32> to vector<3x16xf32>
      %76 = arith.mulf %74, %75 : vector<3x16xf32>
      %c0_51 = arith.constant 0 : index
      %c0_52 = arith.constant 0 : index
      %c0_53 = arith.constant 0 : index
      %77 = vector.load %arg14[%c0_51, %c0_52, %c0_53] : memref<1x3x16xf32, #tpu.memory_space<vmem>>, vector<1x3x16xf32>
      %78 = vector.shape_cast %77 : vector<1x3x16xf32> to vector<3x16xf32>
      %79 = vector.shape_cast %76 : vector<3x16xf32> to vector<1x3x16xf32>
      tpu.vector_store %arg14[%c0_51, %c0_52, %c0_53], %79 {strides = array<i32>} : memref<1x3x16xf32, #tpu.memory_space<vmem>>, vector<1x3x16xf32>,
      %c0_54 = arith.constant 0 : index
      %c0_55 = arith.constant 0 : index
      %c0_56 = arith.constant 0 : index
      %80 = vector.load %arg2[%c0_54, %c0_55, %c0_56] : memref<1x3x16xf32, #tpu.memory_space<vmem>>, vector<1x3x16xf32>
      %81 = vector.shape_cast %80 : vector<1x3x16xf32> to vector<3x16xf32>
      %cst_57 = arith.constant dense<0.000000e+00> : vector<3xf32>
      %82 = vector.multi_reduction <add>, %81, %cst_57 [1] : vector<3x16xf32> to vector<3xf32>
      %83 = vector.shape_cast %82 : vector<3xf32> to vector<3x1xf32>
      %cst_58 = arith.constant 1.600000e+01 : f32
      %84 = vector.broadcast %cst_58 : f32 to vector<3x1xf32>
      %85 = arith.divf %83, %84 : vector<3x1xf32>
      %cst_59 = arith.constant dense<0.000000e+00> : vector<3xf32>
      %86 = vector.multi_reduction <add>, %76, %cst_59 [1] : vector<3x16xf32> to vector<3xf32>
      %87 = vector.shape_cast %86 : vector<3xf32> to vector<3x1xf32>
      %cst_60 = arith.constant 1.600000e+01 : f32
      %88 = vector.broadcast %cst_60 : f32 to vector<3x1xf32>
      %89 = arith.divf %87, %88 : vector<3x1xf32>
      %90 = vector.broadcast %85 : vector<3x1xf32> to vector<3x16xf32>
      %91 = arith.subf %81, %90 : vector<3x16xf32>
      %92 = vector.broadcast %89 : vector<3x1xf32> to vector<3x16xf32>
      %93 = arith.subf %76, %92 : vector<3x16xf32>
      %cst_61 = arith.constant dense<0.000000e+00> : vector<3x3xf32>
      %94 = tpu.matmul %91, %93, %cst_61 {dimension_numbers = #tpu.dot_dimension_numbers<[1], [1], [0], [0], [0, 0, 1, 0], [], []>} : vector<3x16xf32>, vector<3x16xf32>, vector<3x3xf32> -> vector<3x3xf32>
      %95 = tpu.concatenate %94, %85, %89 in 1 : vector<3x3xf32>, vector<3x1xf32>, vector<3x1xf32> -> vector<3x5xf32>
      %c0_62 = arith.constant 0 : index
      %c0_63 = arith.constant 0 : index
      %c0_64 = arith.constant 0 : index
      %96 = vector.load %arg15[%c0_62, %c0_63, %c0_64] : memref<1x3x5xf32, #tpu.memory_space<vmem>>, vector<1x3x5xf32>
      %97 = vector.shape_cast %96 : vector<1x3x5xf32> to vector<3x5xf32>
      %98 = vector.shape_cast %95 : vector<3x5xf32> to vector<1x3x5xf32>
      tpu.vector_store %arg15[%c0_62, %c0_63, %c0_64], %98 {strides = array<i32>} : memref<1x3x5xf32, #tpu.memory_space<vmem>>, vector<1x3x5xf32>,
    } else {
    }
    return
  }
  func.func @transform_0(%arg0: i32, %arg1: i32) -> (i32, i32, i32) {
    %c0_i32 = arith.constant 0 : i32
    %c0_i32_0 = arith.constant 0 : i32
    %c0_i32_1 = arith.constant 0 : i32
    return %arg0, %c0_i32, %c0_i32_0 : i32, i32, i32
  }
  func.func @transform_1(%arg0: i32, %arg1: i32) -> (i32, i32, i32) {
    %c0_i32 = arith.constant 0 : i32
    %c0_i32_0 = arith.constant 0 : i32
    return %arg0, %c0_i32, %arg1 : i32, i32, i32
  }
  func.func @transform_2(%arg0: i32, %arg1: i32) -> (i32, i32) {
    %c0_i32 = arith.constant 0 : i32
    %c0_i32_0 = arith.constant 0 : i32
    %c0_i32_1 = arith.constant 0 : i32
    return %c0_i32, %c0_i32_0 : i32, i32
  }
  func.func @transform_3(%arg0: i32, %arg1: i32) -> (i32, i32) {
    %c0_i32 = arith.constant 0 : i32
    %c0_i32_0 = arith.constant 0 : i32
    %c0_i32_1 = arith.constant 0 : i32
    return %c0_i32, %c0_i32_0 : i32, i32
  }
  func.func @transform_4(%arg0: i32, %arg1: i32) -> (i32, i32) {
    %c0_i32 = arith.constant 0 : i32
    %c0_i32_0 = arith.constant 0 : i32
    %c0_i32_1 = arith.constant 0 : i32
    return %c0_i32, %c0_i32_0 : i32, i32
  }
  func.func @transform_5(%arg0: i32, %arg1: i32) -> (i32, i32) {
    %c0_i32 = arith.constant 0 : i32
    %c0_i32_0 = arith.constant 0 : i32
    %c0_i32_1 = arith.constant 0 : i32
    return %c0_i32, %c0_i32_0 : i32, i32
  }
  func.func @transform_6(%arg0: i32, %arg1: i32) -> (i32, i32) {
    %c0_i32 = arith.constant 0 : i32
    %c0_i32_0 = arith.constant 0 : i32
    %c0_i32_1 = arith.constant 0 : i32
    return %c0_i32, %c0_i32_0 : i32, i32
  }
  func.func @transform_7(%arg0: i32, %arg1: i32) -> (i32, i32) {
    %c0_i32 = arith.constant 0 : i32
    %c0_i32_0 = arith.constant 0 : i32
    %c0_i32_1 = arith.constant 0 : i32
    return %c0_i32, %c0_i32_0 : i32, i32
  }
  func.func @transform_8(%arg0: i32, %arg1: i32) -> (i32, i32) {
    %c0_i32 = arith.constant 0 : i32
    %c0_i32_0 = arith.constant 0 : i32
    %c0_i32_1 = arith.constant 0 : i32
    return %c0_i32, %c0_i32_0 : i32, i32
  }
  func.func @transform_9(%arg0: i32, %arg1: i32) -> (i32, i32) {
    %c0_i32 = arith.constant 0 : i32
    %c0_i32_0 = arith.constant 0 : i32
    %c0_i32_1 = arith.constant 0 : i32
    return %c0_i32, %c0_i32_0 : i32, i32
  }
  func.func @transform_10(%arg0: i32, %arg1: i32) -> (i32, i32) {
    %c0_i32 = arith.constant 0 : i32
    %c0_i32_0 = arith.constant 0 : i32
    %c0_i32_1 = arith.constant 0 : i32
    return %c0_i32, %c0_i32_0 : i32, i32
  }
  func.func @transform_11(%arg0: i32, %arg1: i32) -> (i32, i32) {
    %c0_i32 = arith.constant 0 : i32
    %c0_i32_0 = arith.constant 0 : i32
    %c0_i32_1 = arith.constant 0 : i32
    return %c0_i32, %c0_i32_0 : i32, i32
  }
  func.func @transform_12(%arg0: i32, %arg1: i32) -> (i32, i32, i32) {
    %c0_i32 = arith.constant 0 : i32
    %c0_i32_0 = arith.constant 0 : i32
    %c0_i32_1 = arith.constant 0 : i32
    return %arg0, %c0_i32, %c0_i32_0 : i32, i32, i32
  }
  func.func @transform_13(%arg0: i32, %arg1: i32) -> (i32, i32, i32) {
    %c0_i32 = arith.constant 0 : i32
    %c0_i32_0 = arith.constant 0 : i32
    %c0_i32_1 = arith.constant 0 : i32
    return %arg0, %c0_i32, %c0_i32_0 : i32, i32, i32
  }
}

</mosaic_0001>

<bundles_post_ra>
// kernel: tpu_custom_call.1
= control target key start
LH: loop header
LB: loop body
LE: loop exit
PB: predicated region body
PF: predicated region fallthrough
CT: control target
= control target key end

     0   :  { %s3218_s25 = smov 0   ;;  %s3220_s26 = smov 0   ;;  %s3821_s0 = inlined_call_operand.vmem [shape: f32[2,3,16], index: 0, kind: input, shape index: {}]   ;;  %s3822_s1 = inlined_call_operand.vmem [shape: f32[2,4,16], index: 1, kind: input, shape index: {}]   ;;  %s3823_s2 = inlined_call_operand.vmem [shape: bf16[64,3], index: 2, kind: input, shape index: {}]   ;;  %s3824_s3 = inlined_call_operand.vmem [shape: bf16[64,64], index: 3, kind: input, shape index: {}]   ;;  %s3825_s4 = inlined_call_operand.vmem [shape: bf16[64,64], index: 4, kind: input, shape index: {}]   ;;  %s3826_s5 = inlined_call_operand.vmem [shape: bf16[128,64], index: 5, kind: input, shape index: {}]   ;;  %s3827_s6 = inlined_call_operand.vmem [shape: bf16[32,128], index: 6, kind: input, shape index: {}]   ;;  %s3828_s7 = inlined_call_operand.vmem [shape: f32[64,1], index: 7, kind: input, shape index: {}]   ;;  %s3829_s8 = inlined_call_operand.vmem [shape: f32[64,1], index: 8, kind: input, shape index: {}]   ;;  %s3830_s9 = inlined_call_operand.vmem [shape: f32[64,1], index: 9, kind: input, shape index: {}]   ;;  %s3831_s10 = inlined_call_operand.vmem [shape: f32[128,1], index: 10, kind: input, shape index: {}]   ;;  %s3832_s11 = inlined_call_operand.vmem [shape: f32[32,1], index: 11, kind: input, shape index: {}]   ;;  %s3833_s12 = inlined_call_operand.vmem [shape: f32[2,3,16], index: 12, kind: output, shape index: {0}]   ;;  %s3834_s13 = inlined_call_operand.vmem [shape: f32[2,3,5], index: 13, kind: output, shape index: {1}]  }
   0x1   :  { %s3222_s27 = smov 0  }
   0x2 LB: > { %s36_s28 = sadd.s32 1, %s3137_s26  ;;  %p2657_p0 = scmp.ge.s32.totalorder %s3141_s27, 1  ;;  %s3141_s27 = sphi %s3222_s27, %s24_s27   ;;  %s3137_s26 = sphi %s3220_s26, %s3839_s26   ;;  %s3133_s25 = sphi %s3218_s25, %s3838_s25  }
   0x3   : > { %p38_p1 = scmp.ge.s32.totalorder %s36_s28, 2  ;;  %p415_p2 = scmp.lt.s32.totalorder %s3141_s27, 3 }
   0x5   : > { %s3841_s28 = smov (%p38_p1, %s36_s28), 0  ;;  %p416_p3 = pnand %p2657_p0, %p415_p2 }
   0x7   : > { %419 = sbr.rel (%p416_p3) target bundleno = 3145 (0xc49), region = 68 }
   0xe   : > { %v3239_v0 = vld [vmem:[%s3828_s7 + $0x10] sm:$0xff]  ;;  %v3244_v1 = vld [vmem:[%s3828_s7] sm:$0xff]  ;;  %p468_p4 = scmp.lt.s32.totalorder %s3133_s25, 1  ;;  %vm583_vm0 = vcmask 1040384   ;;  %v3143_v2 = vmov 0   ;;  %v3249_v3 = vld [vmem:[%s3828_s7 + $0x18] sm:$0xff] }
   0xf   : > { %3066 = vset.pattern.permute.xlu1 %v3143_v2  ;;  %3065 = vset.pattern.permute.xlu0 %v3143_v2  ;;  %v3256_v4 = vld [vmem:[%s3828_s7 + $0x8] sm:$0xff]  ;;  %vm584_vm1 = vcmask 1041408   ;;  %vm570_vm2 = vcmask 23552   ;;  %v3144_v5 = vmov 65535   ;;  %v3067_v7 = vld [vmem:[%s3823_s2] sm:$0xff]   ;;  %v3291_v14 = vld [vmem:[%s3828_s7 + $0x38] sm:$0xff] }
  0x10   : > { %522 = vperm.xlu1 %3066, %v3239_v0   ;;  %512 = vperm.xlu0 %3065, %v3244_v1   ;;  %s3843_s25 = smov (!%p468_p4, %s3133_s25), 1  ;;  %v585_v6 = vsel %vm583_vm0, 4294967295, %v3144_v5  ;;  %v3275_v8 = vld [vmem:[%s3828_s7 + $0x28] sm:$0xff]  ;;  %v3283_v11 = vld [vmem:[%s3828_s7 + $0x20] sm:$0xff]  ;;  %v3296_v15 = vld [vmem:[%s3828_s7 + $0x30] sm:$0xff]  ;;  %vm743_vm3 = vcmask 523264  }
  0x11   : > { %s3261_s22 = sshll.u32 %s3843_s25, 2  ;;  %2847 = vmatprep.mubr.msk.bf16.mxu0 %vm570_vm2, %v3067_v7  ;;  %v3278_v10 = vsel %vm584_vm1, %v585_v6, 0  ;;  %v3068_v16 = vld [vmem:[%s3823_s2 + $0x8] sm:$0xff]   ;;  %v3069_v17 = vld [vmem:[%s3823_s2 + $0x10] sm:$0xff]   ;;  %v3315_v19 = vld [vmem:[%s3829_s8] sm:$0xff]  ;;  %vm1390_vm4 = vcmask 130048  }
  0x12   : > { %s3267_s29 = scalar_lea.vmem %s3821_s0, %s3261_s22  ;;  %v3310_v18 = vld [vmem:[%s3829_s8 + $0x8] sm:$0xff]  ;;  %v3321_v20 = vld [vmem:[%s3829_s8 + $0x18] sm:$0xff]  ;;  %v3326_v21 = vld [vmem:[%s3829_s8 + $0x10] sm:$0xff]  ;;  %s478_s25 = scalar_lea.vmem %s3822_s1, %s3261_s22  ;;  %vm3146_vm5 = vmmov 0   ;;  %vm2313_vm6 = vcmask 261120   ;;  %vm1393_vm7 = vcmask 122880  }
  0x13   : > { %v492_v9 = vld [vmem:[%s3267_s29] sm:$0x7]  ;;  %v3070_v22 = vld [vmem:[%s3823_s2 + $0x18] sm:$0xff]   ;;  %v3336_v23 = vld [vmem:[%s3829_s8 + $0x28] sm:$0xff]  ;;  %vm1395_vm8 = vcmask 125952   ;;  %vm2451_vm9 = vcmask 124928   ;;  %s486_s17 = scalar_lea.vmem %s3834_s13, %s3261_s22 }
  0x14   : > { %527 = vperm.xlu1 %3066, %v3249_v3   ;;  %517 = vperm.xlu0 %3065, %v3256_v4   ;;  %v493_v12 = vpack.c.bf16 %v492_v9, %v492_v9  ;;  %v3341_v24 = vld [vmem:[%s3829_s8 + $0x20] sm:$0xff]  ;;  %v3349_v25 = vld [vmem:[%s3829_s8 + $0x38] sm:$0xff]  ;;  %v3354_v26 = vld [vmem:[%s3829_s8 + $0x30] sm:$0xff]  ;;  %vm2542_vm10 = vcmask 31744   ;;  %vm2544_vm11 = vcmask 34816  }
  0x15   : > { %v3361_v27 = vld [vmem:[%s3830_s9 + $0x8] sm:$0xff]  ;;  %v3366_v28 = vld [vmem:[%s3830_s9] sm:$0xff]  ;;  %v3373_v29 = vld [vmem:[%s3830_s9 + $0x18] sm:$0xff] }
  0x16   : > { %v588_v13 = vand.u32 %v3278_v10, %v493_v12  ;;  %v3378_v30 = vld [vmem:[%s3830_s9 + $0x10] sm:$0xff]  ;;  %v846_v31 = vld [vmem:[%s3830_s9 + $0x28] sm:$0xff]  ;;  %v845_v32 = vld [vmem:[%s3830_s9 + $0x20] sm:$0xff] }
  0x17   : > { %v3393_v33 = vld [vmem:[%s3830_s9 + $0x38] sm:$0xff]  ;;  %v847_v34 = vld [vmem:[%s3830_s9 + $0x30] sm:$0xff]  ;;  %v1015_v35 = vld [vmem:[%s3831_s10 + $0x8] sm:$0xff] }
  0x18   : > { %537 = vperm.xlu1 %3066, %v3275_v8   ;;  %532 = vperm.xlu0 %3065, %v3283_v11   ;;  %v1014_v36 = vld [vmem:[%s3831_s10] sm:$0xff]  ;;  %v1017_v37 = vld [vmem:[%s3831_s10 + $0x18] sm:$0xff]  ;;  %v1016_v38 = vld [vmem:[%s3831_s10 + $0x10] sm:$0xff] }
  0x19   : > { %2845 = vmatprep.subr.bf16.mxu0 %v588_v13  ;;  %v1019_v39 = vld [vmem:[%s3831_s10 + $0x28] sm:$0xff]  ;;  %v1018_v40 = vld [vmem:[%s3831_s10 + $0x20] sm:$0xff]  ;;  %v1021_v41 = vld [vmem:[%s3831_s10 + $0x38] sm:$0xff] }
  0x1a   : > { %2846 = vmatpush3.bf16.msra.mxu0 %v588_v13  ;;  %v1020_v42 = vld [vmem:[%s3831_s10 + $0x30] sm:$0xff]  ;;  %v1023_v43 = vld [vmem:[%s3831_s10 + $0x48] sm:$0xff]  ;;  %v1022_v44 = vld [vmem:[%s3831_s10 + $0x40] sm:$0xff] }
  0x1b   : > { %v1025_v45 = vld [vmem:[%s3831_s10 + $0x58] sm:$0xff]  ;;  %v1024_v46 = vld [vmem:[%s3831_s10 + $0x50] sm:$0xff]  ;;  %v1027_v47 = vld [vmem:[%s3831_s10 + $0x68] sm:$0xff] }
  0x1c   : > { %547 = vperm.xlu1 %3066, %v3291_v14   ;;  %542 = vperm.xlu0 %3065, %v3296_v15   ;;  %v1026_v48 = vld [vmem:[%s3831_s10 + $0x60] sm:$0xff]  ;;  %v1029_v49 = vld [vmem:[%s3831_s10 + $0x78] sm:$0xff]  ;;  %v1028_v50 = vld [vmem:[%s3831_s10 + $0x70] sm:$0xff] }
  0x1d   : > { %2848 = vmatmul.mubr.msk.bf16.vlgmr.msra.gmra.mrb[0].mxu0 %vm570_vm2, %v3068_v16  ;;  %v3071_v51 = vld [vmem:[%s3824_s3] sm:$0xff]   ;;  %v2205_v52 = vld [vmem:[%s3832_s11 + $0x8] sm:$0xff]  ;;  %v2207_v54 = vld [vmem:[%s3832_s11 + $0x18] sm:$0xff] }
  0x1e   : > { %2851 = vmatprep.mubr.msk.bf16.mxu0 %vm570_vm2, %v3069_v17  ;;  %2863 = vmatprep.mubr.msk.bf16.mxu1 %vm743_vm3, %v3071_v51  ;;  %v2204_v53 = vld [vmem:[%s3832_s11] sm:$0xff]  ;;  %v2206_v55 = vld [vmem:[%s3832_s11 + $0x10] sm:$0xff] }
  0x20   : > { %690 = vperm.xlu1 %3066, %v3310_v18   ;;  %685 = vperm.xlu0 %3065, %v3315_v19  }
  0x24   : > { %700 = vperm.xlu1 %3066, %v3321_v20   ;;  %695 = vperm.xlu0 %3065, %v3326_v21  }
  0x25   : > { %2852 = vmatmul.mubr.msk.bf16.gmra.mrb[4].mxu0 %vm570_vm2, %v3070_v22 }
  0x28   : > { %710 = vperm.xlu1 %3066, %v3336_v23   ;;  %705 = vperm.xlu0 %3065, %v3341_v24  }
  0x2c   : > { %720 = vperm.xlu1 %3066, %v3349_v25   ;;  %715 = vperm.xlu0 %3065, %v3354_v26  }
  0x30   : > { %856 = vperm.xlu1 %3066, %v3361_v27   ;;  %851 = vperm.xlu0 %3065, %v3366_v28  }
  0x34   : > { %866 = vperm.xlu1 %3066, %v3373_v29   ;;  %861 = vperm.xlu0 %3065, %v3378_v30  }
  0x38   : > { %876 = vperm.xlu1 %3066, %v846_v31   ;;  %871 = vperm.xlu0 %3065, %v845_v32  }
  0x3c   : > { %886 = vperm.xlu1 %3066, %v3393_v33   ;;  %881 = vperm.xlu0 %3065, %v847_v34  }
  0x40   : > { %1037 = vperm.xlu1 %3066, %v1015_v35   ;;  %1032 = vperm.xlu0 %3065, %v1014_v36  }
  0x44   : > { %1047 = vperm.xlu1 %3066, %v1017_v37   ;;  %1042 = vperm.xlu0 %3065, %v1016_v38  }
  0x48   : > { %1057 = vperm.xlu1 %3066, %v1019_v39   ;;  %1052 = vperm.xlu0 %3065, %v1018_v40  }
  0x4c   : > { %1067 = vperm.xlu1 %3066, %v1021_v41   ;;  %1062 = vperm.xlu0 %3065, %v1020_v42  }
  0x50   : > { %1077 = vperm.xlu1 %3066, %v1023_v43   ;;  %1072 = vperm.xlu0 %3065, %v1022_v44  }
  0x54   : > { %1087 = vperm.xlu1 %3066, %v1025_v45   ;;  %1082 = vperm.xlu0 %3065, %v1024_v46  }
  0x58   : > { %1097 = vperm.xlu1 %3066, %v1027_v47   ;;  %1092 = vperm.xlu0 %3065, %v1026_v48  }
  0x5c   : > { %1107 = vperm.xlu1 %3066, %v1029_v49   ;;  %1102 = vperm.xlu0 %3065, %v1028_v50  }
  0x60   : > { %1422 = vperm.xlu1 %3066, %v3256_v4   ;;  %1417 = vperm.xlu0 %3065, %v3244_v1  }
  0x64   : > { %1432 = vperm.xlu1 %3066, %v3249_v3   ;;  %1427 = vperm.xlu0 %3065, %v3239_v0  }
  0x68   : > { %1442 = vperm.xlu1 %3066, %v3275_v8   ;;  %1437 = vperm.xlu0 %3065, %v3283_v11  }
  0x6c   : > { %1452 = vperm.xlu1 %3066, %v3291_v14   ;;  %1447 = vperm.xlu0 %3065, %v3296_v15  }
  0x70   : > { %1595 = vperm.xlu1 %3066, %v3310_v18   ;;  %1590 = vperm.xlu0 %3065, %v3315_v19  }
  0x74   : > { %1605 = vperm.xlu1 %3066, %v3321_v20   ;;  %1600 = vperm.xlu0 %3065, %v3326_v21  }
  0x78   : > { %1615 = vperm.xlu1 %3066, %v3336_v23   ;;  %1610 = vperm.xlu0 %3065, %v3341_v24  }
  0x7c   : > { %1625 = vperm.xlu1 %3066, %v3349_v25   ;;  %1620 = vperm.xlu0 %3065, %v3354_v26  }
  0x80   : > { %1761 = vperm.xlu1 %3066, %v3361_v27   ;;  %1756 = vperm.xlu0 %3065, %v3366_v28  }
  0x84   : > { %1771 = vperm.xlu1 %3066, %v3373_v29   ;;  %1766 = vperm.xlu0 %3065, %v3378_v30   ;;  %v3072_v29 = vld [vmem:[%s3824_s3 + $0x8] sm:$0xff]   ;;  %v3073_v30 = vld [vmem:[%s3824_s3 + $0x10] sm:$0xff]  }
  0x88   : > { %1781 = vperm.xlu1 %3066, %v846_v31   ;;  %1776 = vperm.xlu0 %3065, %v845_v32   ;;  %v3074_v31 = vld [vmem:[%s3824_s3 + $0x18] sm:$0xff]   ;;  %v3075_v32 = vld [vmem:[%s3825_s4] sm:$0xff]  }
  0x89   : > { %2879 = vmatprep.mubr.msk.bf16.mxu0 %vm743_vm3, %v3075_v32 }
  0x8c   : > { %1791 = vperm.xlu1 %3066, %v3393_v33   ;;  %1786 = vperm.xlu0 %3065, %v847_v34  }
  0x8f   : > { %v513_v56 = vpop.permute.xlu0 %512  ;;  %v523_v57 = vpop.permute.xlu1 %522 }
  0x90   : > { %1942 = vperm.xlu1 %3066, %v1015_v35   ;;  %1937 = vperm.xlu0 %3065, %v1014_v36  }
  0x93   : > { %v518_v58 = vpop.permute.xlu0 %517  ;;  %v528_v59 = vpop.permute.xlu1 %527 }
  0x94   : > { %1952 = vperm.xlu1 %3066, %v1017_v37   ;;  %1947 = vperm.xlu0 %3065, %v1016_v38  }
  0x97   : > { %v533_v63 = vpop.permute.xlu0 %532  ;;  %v538_v3 = vpop.permute.xlu1 %537 }
  0x98   : > { %1962 = vperm.xlu1 %3066, %v1019_v39   ;;  %1957 = vperm.xlu0 %3065, %v1018_v40  }
  0x9b   : > { %v543_v12 = vpop.permute.xlu0 %542  ;;  %v548_v17 = vpop.permute.xlu1 %547 }
  0x9c   : > { %1972 = vperm.xlu1 %3066, %v1021_v41   ;;  %1967 = vperm.xlu0 %3065, %v1020_v42  }
  0x9f   : > { %v686_v33 = vpop.permute.xlu0 %685  ;;  %v691_v34 = vpop.permute.xlu1 %690 }
  0xa0   : > { %1982 = vperm.xlu1 %3066, %v1023_v43   ;;  %1977 = vperm.xlu0 %3065, %v1022_v44  }
  0xa3   : > { %v696_v35 = vpop.permute.xlu0 %695  ;;  %v701_v36 = vpop.permute.xlu1 %700 }
  0xa4   : > { %1992 = vperm.xlu1 %3066, %v1025_v45   ;;  %1987 = vperm.xlu0 %3065, %v1024_v46  }
  0xa7   : > { %v706_v40 = vpop.permute.xlu0 %705  ;;  %v711_v45 = vpop.permute.xlu1 %710 }
  0xa8   : > { %2002 = vperm.xlu1 %3066, %v1027_v47   ;;  %1997 = vperm.xlu0 %3065, %v1026_v48  }
  0xac   : > { %2012 = vperm.xlu1 %3066, %v1029_v49   ;;  %2007 = vperm.xlu0 %3065, %v1028_v50  }
  0xb0   : > { %2215 = vperm.xlu1 %3066, %v2205_v52   ;;  %2210 = vperm.xlu0 %3065, %v2204_v53  }
  0xb4   : > { %2225 = vperm.xlu1 %3066, %v2207_v54   ;;  %2220 = vperm.xlu0 %3065, %v2206_v55  }
  0xb8   : > { %1310 = vperm.xlu1 %3066, %v2205_v52   ;;  %1305 = vperm.xlu0 %3065, %v2204_v53   ;;  %v716_v52 = vpop.permute.xlu0 %715 }
  0xbc   : > { %1320 = vperm.xlu1 %3066, %v2207_v54   ;;  %1315 = vperm.xlu0 %3065, %v2206_v55  }
  0xf0   : > { %v2849_v60 = vpop.f32.mrb[0].mxu0 }
  0xf1   : > { %v633_v61 = vadd.f32 %v2849_v60, %v523_v57  ;;  %v624_v62 = vpop.f32.mrb[1].mxu0  ;;  %v721_v57 = vpop.permute.xlu1 %720 }
  0xf2   : > { %v2850_v0 = vpop.f32.mrb[2].mxu0  ;;  %v625_v1 = vadd.f32 %v624_v62, %v513_v56 }
  0xf3   : > { %v636_v2 = vadd.f32 %v2850_v0, %v528_v59  ;;  %v627_v4 = vpop.f32.mrb[3].mxu0  ;;  %v657_v5 = vmax.f32 %v633_v61, 0.0 }
  0xf4   : > { %v628_v7 = vadd.f32 %v627_v4, %v518_v58  ;;  %v655_v8 = vmax.f32 %v625_v1, 0.0 }
  0xf5   : > { %v658_v6 = vmax.f32 %v636_v2, 0.0 }
  0xf6   : > { %v656_v11 = vmax.f32 %v628_v7, 0.0  ;;  %v3078_v7 = vld [vmem:[%s3825_s4 + $0x18] sm:$0xff]  }
  0xf7   : > { %v664_v9 = vpack.c.bf16 %v658_v6, %v657_v5  ;;  %v3076_v5 = vld [vmem:[%s3825_s4 + $0x8] sm:$0xff]   ;;  %v3077_v6 = vld [vmem:[%s3825_s4 + $0x10] sm:$0xff]  }
  0xf8   : > { %v2853_v13 = vpop.f32.mrb[4].mxu0  ;;  %v663_v16 = vpack.c.bf16 %v656_v11, %v655_v8  ;;  %v3079_v8 = vld [vmem:[%s3826_s5] sm:$0xff]   ;;  %v857_v11 = vpop.permute.xlu1 %856 }
  0xf9   : > { %v649_v14 = vadd.f32 %v2853_v13, %v543_v12  ;;  %v640_v15 = vpop.f32.mrb[5].mxu0 }
  0xfa   : > { %v2854_v18 = vpop.f32.mrb[6].mxu0  ;;  %v641_v19 = vadd.f32 %v640_v15, %v533_v63  ;;  %2855 = vmatprep.subr.bf16.mxu1 %v663_v16 }
  0xfb   : > { %v652_v20 = vadd.f32 %v2854_v18, %v548_v17  ;;  %v643_v21 = vpop.f32.mrb[7].mxu0  ;;  %2856 = vmatpush3.bf16.msra.mxu1 %v663_v16  ;;  %v661_v22 = vmax.f32 %v649_v14, 0.0 }
  0xfc   : > { %v644_v24 = vadd.f32 %v643_v21, %v538_v3  ;;  %2857 = vmatprep.subr.bf16.mxu1 %v664_v9  ;;  %v659_v25 = vmax.f32 %v641_v19, 0.0  ;;  %v867_v13 = vpop.permute.xlu1 %866 }
  0xfd   : > { %v662_v23 = vmax.f32 %v652_v20, 0.0 }
  0xfe   : > { %v660_v27 = vmax.f32 %v644_v24, 0.0 }
  0xff   : > { %v666_v26 = vpack.c.bf16 %v662_v23, %v661_v22  ;;  %2858 = vmatpush3.bf16.msra.mxu1 %v664_v9  ;;  %v852_v9 = vpop.permute.xlu0 %851 }
 0x100   : > { %v665_v28 = vpack.c.bf16 %v660_v27, %v659_v25  ;;  %v877_v22 = vpop.permute.xlu1 %876 }
 0x102   : > { %2859 = vmatprep.subr.bf16.mxu1 %v665_v28 }
 0x103   : > { %2860 = vmatpush3.bf16.msra.mxu1 %v665_v28  ;;  %v862_v12 = vpop.permute.xlu0 %861 }
 0x104   : > { %2861 = vmatprep.subr.bf16.mxu1 %v666_v26 }
 0x107   : > { %2862 = vmatpush3.bf16.msra.mxu1 %v666_v26  ;;  %v872_v17 = vpop.permute.xlu0 %871 }
 0x10a   : > { %2864 = vmatmul.mubr.msk.bf16.vlgmr.msra.gmra.mrb[0].mxu1 %vm743_vm3, %v3072_v29 }
 0x10b   : > { %2867 = vmatprep.mubr.msk.bf16.mxu1 %vm743_vm3, %v3073_v30  ;;  %v882_v29 = vpop.permute.xlu0 %881 }
 0x112   : > { %2868 = vmatmul.mubr.msk.bf16.gmra.mrb[4].mxu1 %vm743_vm3, %v3074_v31 }
 0x113   : > { %2895 = vmatprep.mubr.msk.bf16.mxu1 %vm743_vm3, %v3079_v8 }
 0x1dd   : > { %v2865_v37 = vpop.f32.mrb[0].mxu1 }
 0x1de   : > { %v799_v38 = vadd.f32 %v2865_v37, %v696_v35  ;;  %v790_v39 = vpop.f32.mrb[1].mxu1 }
 0x1df   : > { %v791_v41 = vadd.f32 %v790_v39, %v686_v33  ;;  %v2866_v42 = vpop.f32.mrb[2].mxu1 }
 0x1e0   : > { %v802_v43 = vadd.f32 %v2866_v42, %v701_v36  ;;  %v793_v44 = vpop.f32.mrb[3].mxu1  ;;  %v823_v47 = vmax.f32 %v799_v38, 0.0 }
 0x1e1   : > { %v794_v46 = vadd.f32 %v793_v44, %v691_v34  ;;  %v821_v49 = vmax.f32 %v791_v41, 0.0  ;;  %v887_v34 = vpop.permute.xlu1 %886 }
 0x1e2   : > { %v824_v48 = vmax.f32 %v802_v43, 0.0 }
 0x1e3   : > { %v822_v50 = vmax.f32 %v794_v46, 0.0  ;;  %v3080_v46 = vld [vmem:[%s3826_s5 + $0x8] sm:$0xff]  }
 0x1e4   : > { %v830_v51 = vpack.c.bf16 %v824_v48, %v823_v47  ;;  %v3081_v47 = vld [vmem:[%s3826_s5 + $0x10] sm:$0xff]   ;;  %v3082_v48 = vld [vmem:[%s3826_s5 + $0x18] sm:$0xff]  }
 0x1e5   : > { %v829_v53 = vpack.c.bf16 %v822_v50, %v821_v49  ;;  %v2869_v54 = vpop.f32.mrb[4].mxu1  ;;  %v3083_v49 = vld [vmem:[%s3826_s5 + $0x20] sm:$0xff]   ;;  %v3084_v50 = vld [vmem:[%s3826_s5 + $0x28] sm:$0xff]  }
 0x1e6   : > { %v815_v55 = vadd.f32 %v2869_v54, %v716_v52  ;;  %v806_v56 = vpop.f32.mrb[5].mxu1  ;;  %v3086_v52 = vld [vmem:[%s3826_s5 + $0x38] sm:$0xff]   ;;  %v1033_v54 = vpop.permute.xlu0 %1032 }
 0x1e7   : > { %v807_v58 = vadd.f32 %v806_v56, %v706_v40  ;;  %v2870_v59 = vpop.f32.mrb[6].mxu1  ;;  %2871 = vmatprep.subr.bf16.mxu0 %v829_v53 }
 0x1e8   : > { %v818_v60 = vadd.f32 %v2870_v59, %v721_v57  ;;  %v809_v61 = vpop.f32.mrb[7].mxu1  ;;  %2872 = vmatpush3.bf16.msra.mxu0 %v829_v53  ;;  %v827_v63 = vmax.f32 %v815_v55, 0.0  ;;  %v3087_v53 = vld [vmem:[%s3827_s6] sm:$0xff]   ;;  %v1038_v55 = vpop.permute.xlu1 %1037 }
 0x1e9   : > { %v810_v62 = vadd.f32 %v809_v61, %v711_v45  ;;  %2873 = vmatprep.subr.bf16.mxu0 %v830_v51  ;;  %v825_v1 = vmax.f32 %v807_v58, 0.0 }
 0x1ea   : > { %v828_v0 = vmax.f32 %v818_v60, 0.0  ;;  %v1043_v56 = vpop.permute.xlu0 %1042 }
 0x1eb   : > { %v826_v2 = vmax.f32 %v810_v62, 0.0 }
 0x1ec   : > { %v832_v3 = vpack.c.bf16 %v828_v0, %v827_v63  ;;  %2874 = vmatpush3.bf16.msra.mxu0 %v830_v51  ;;  %v3085_v51 = vld [vmem:[%s3826_s5 + $0x30] sm:$0xff]   ;;  %v1048_v57 = vpop.permute.xlu1 %1047 }
 0x1ed   : > { %v831_v4 = vpack.c.bf16 %v826_v2, %v825_v1 }
 0x1ee   : > { %v1053_v58 = vpop.permute.xlu0 %1052 }
 0x1ef   : > { %2875 = vmatprep.subr.bf16.mxu0 %v831_v4 }
 0x1f0   : > { %2876 = vmatpush3.bf16.msra.mxu0 %v831_v4  ;;  %v1058_v59 = vpop.permute.xlu1 %1057 }
 0x1f1   : > { %2877 = vmatprep.subr.bf16.mxu0 %v832_v3 }
 0x1f2   : > { %v1063_v60 = vpop.permute.xlu0 %1062 }
 0x1f4   : > { %2878 = vmatpush3.bf16.msra.mxu0 %v832_v3  ;;  %v1068_v0 = vpop.permute.xlu1 %1067 }
 0x1f6   : > { %v1073_v8 = vpop.permute.xlu0 %1072 }
 0x1f7   : > { %2880 = vmatmul.mubr.msk.bf16.vlgmr.msra.gmra.mrb[8].mxu0 %vm743_vm3, %v3076_v5 }
 0x1f8   : > { %2883 = vmatprep.mubr.msk.bf16.mxu0 %vm743_vm3, %v3077_v6 }
 0x1ff   : > { %2884 = vmatmul.mubr.msk.bf16.gmra.mrb[12].mxu0 %vm743_vm3, %v3078_v7 }
 0x200   : > { %2927 = vmatprep.mubr.bf16.mxu0 %v3087_v53 }
 0x2ca   : > { %v2881_v14 = vpop.f32.mrb[8].mxu0 }
 0x2cb   : > { %v964_v15 = vadd.f32 %v2881_v14, %v862_v12  ;;  %v955_v16 = vpop.f32.mrb[9].mxu0 }
 0x2cc   : > { %v956_v18 = vadd.f32 %v955_v16, %v852_v9  ;;  %v2882_v19 = vpop.f32.mrb[10].mxu0 }
 0x2cd   : > { %v967_v20 = vadd.f32 %v2882_v19, %v867_v13  ;;  %v958_v21 = vpop.f32.mrb[11].mxu0  ;;  %v988_v24 = vmax.f32 %v964_v15, 0.0  ;;  %v1078_v13 = vpop.permute.xlu1 %1077 }
 0x2ce   : > { %v959_v23 = vadd.f32 %v958_v21, %v857_v11  ;;  %v986_v26 = vmax.f32 %v956_v18, 0.0 }
 0x2cf   : > { %v989_v25 = vmax.f32 %v967_v20, 0.0 }
 0x2d0   : > { %v987_v27 = vmax.f32 %v959_v23, 0.0 }
 0x2d1   : > { %v995_v28 = vpack.c.bf16 %v989_v25, %v988_v24 }
 0x2d2   : > { %v994_v30 = vpack.c.bf16 %v987_v27, %v986_v26  ;;  %v2885_v31 = vpop.f32.mrb[12].mxu0  ;;  %v1088_v26 = vpop.permute.xlu1 %1087 }
 0x2d3   : > { %v980_v32 = vadd.f32 %v2885_v31, %v882_v29  ;;  %v971_v33 = vpop.f32.mrb[13].mxu0 }
 0x2d4   : > { %v972_v35 = vadd.f32 %v971_v33, %v872_v17  ;;  %v2886_v36 = vpop.f32.mrb[14].mxu0  ;;  %2887 = vmatprep.subr.bf16.mxu1 %v994_v30 }
 0x2d5   : > { %v983_v37 = vadd.f32 %v2886_v36, %v887_v34  ;;  %v974_v38 = vpop.f32.mrb[15].mxu0  ;;  %2888 = vmatpush3.bf16.msra.mxu1 %v994_v30  ;;  %v992_v40 = vmax.f32 %v980_v32, 0.0 }
 0x2d6   : > { %v975_v39 = vadd.f32 %v974_v38, %v877_v22  ;;  %2889 = vmatprep.subr.bf16.mxu1 %v995_v28  ;;  %v990_v42 = vmax.f32 %v972_v35, 0.0  ;;  %v1083_v22 = vpop.permute.xlu0 %1082 }
 0x2d7   : > { %v993_v41 = vmax.f32 %v983_v37, 0.0 }
 0x2d8   : > { %v991_v43 = vmax.f32 %v975_v39, 0.0  ;;  %v1098_v39 = vpop.permute.xlu1 %1097 }
 0x2d9   : > { %v997_v44 = vpack.c.bf16 %v993_v41, %v992_v40  ;;  %2890 = vmatpush3.bf16.msra.mxu1 %v995_v28 }
 0x2da   : > { %v996_v45 = vpack.c.bf16 %v991_v43, %v990_v42  ;;  %v1093_v34 = vpop.permute.xlu0 %1092 }
 0x2dc   : > { %2891 = vmatprep.subr.bf16.mxu1 %v996_v45 }
 0x2dd   : > { %2892 = vmatpush3.bf16.msra.mxu1 %v996_v45 }
 0x2de   : > { %2893 = vmatprep.subr.bf16.mxu1 %v997_v44 }
 0x2e1   : > { %2894 = vmatpush3.bf16.msra.mxu1 %v997_v44 }
 0x2e4   : > { %2896 = vmatmul.mubr.msk.bf16.vlgmr.msra.gmra.mrb[8].mxu1 %vm743_vm3, %v3080_v46  ;;  %v1103_v46 = vpop.permute.xlu0 %1102 }
 0x2e5   : > { %2899 = vmatprep.mubr.msk.bf16.mxu1 %vm743_vm3, %v3081_v47 }
 0x2ec   : > { %2900 = vmatmul.mubr.msk.bf16.gmra.mrb[12].mxu1 %vm743_vm3, %v3082_v48 }
 0x2ed   : > { %2903 = vmatprep.mubr.msk.bf16.mxu1 %vm743_vm3, %v3083_v49 }
 0x2f4   : > { %2904 = vmatmul.mubr.msk.bf16.gmra.mrb[16].mxu1 %vm743_vm3, %v3084_v50 }
 0x2f5   : > { %2907 = vmatprep.mubr.msk.bf16.mxu1 %vm743_vm3, %v3085_v51  ;;  %v1108_v51 = vpop.permute.xlu1 %1107 }
 0x2fc   : > { %2908 = vmatmul.mubr.msk.bf16.gmra.mrb[20].mxu1 %vm743_vm3, %v3086_v52 }
 0x3b7   : > { %v2897_v61 = vpop.f32.mrb[8].mxu1 }
 0x3b8   : > { %v1217_v62 = vadd.f32 %v2897_v61, %v1043_v56  ;;  %v1208_v63 = vpop.f32.mrb[9].mxu1 }
 0x3b9   : > { %v1209_v1 = vadd.f32 %v1208_v63, %v1033_v54  ;;  %v2898_v2 = vpop.f32.mrb[10].mxu1 }
 0x3ba   : > { %v1220_v3 = vadd.f32 %v2898_v2, %v1048_v57  ;;  %v1211_v4 = vpop.f32.mrb[11].mxu1  ;;  %v1273_v6 = vmax.f32 %v1217_v62, 0.0  ;;  %v1397_v57 = vld [vmem:[%s478_s25] sm:$0xf]  ;;  %v3088_v2 = vld [vmem:[%s3827_s6 + $0x8] sm:$0xff]   ;;  %s482_s25 = scalar_lea.vmem %s3833_s12, %s3261_s22 }
 0x3bb   : > { %v1212_v5 = vadd.f32 %v1211_v4, %v1038_v55  ;;  %v1271_v9 = vmax.f32 %v1209_v1, 0.0  ;;  %v3551_v63 = vpack.c.bf16 %v1397_v57, %v1397_v57  ;;  %v3090_v4 = vld [vmem:[%s3823_s2 + $0x8] sm:$0xff]  }
 0x3bc   : > { %v1274_v7 = vmax.f32 %v1220_v3, 0.0  ;;  %v3089_v3 = vld [vmem:[%s3823_s2] sm:$0xff]  }
 0x3bd   : > { %v1272_v11 = vmax.f32 %v1212_v5, 0.0  ;;  %3836 = vst [vmem:[#allocation5_spill] sm:$0xff] %v3551_v63  ;;  %v1493_v1 = vand.u32 %v3551_v63, %v3278_v10  ;;  %v3091_v10 = vld [vmem:[%s3823_s2 + $0x10] sm:$0xff]   ;;  %v3092_v5 = vld [vmem:[%s3823_s2 + $0x18] sm:$0xff]  }
 0x3be   : > { %v1288_v12 = vpack.c.bf16 %v1274_v7, %v1273_v6  ;;  %v3574_v6 = vpop.permute.xlu0 %1417  ;;  %v3576_v7 = vpop.permute.xlu1 %1422 }
 0x3bf   : > { %v1287_v14 = vpack.c.bf16 %v1272_v11, %v1271_v9  ;;  %v2901_v15 = vpop.f32.mrb[12].mxu1 }
 0x3c0   : > { %v1233_v16 = vadd.f32 %v2901_v15, %v1063_v60  ;;  %v1224_v17 = vpop.f32.mrb[13].mxu1 }
 0x3c1   : > { %v1225_v18 = vadd.f32 %v1224_v17, %v1053_v58  ;;  %v2902_v19 = vpop.f32.mrb[14].mxu1  ;;  %2911 = vmatprep.subr.bf16.mxu0 %v1287_v14 }
 0x3c2   : > { %v1236_v20 = vadd.f32 %v2902_v19, %v1068_v0  ;;  %v1227_v21 = vpop.f32.mrb[15].mxu1  ;;  %2912 = vmatpush3.bf16.msra.mxu0 %v1287_v14  ;;  %v1277_v24 = vmax.f32 %v1233_v16, 0.0  ;;  %v3580_v9 = vpop.permute.xlu1 %1432 }
 0x3c3   : > { %v1228_v23 = vadd.f32 %v1227_v21, %v1058_v59  ;;  %2913 = vmatprep.subr.bf16.mxu0 %v1288_v12  ;;  %v1275_v27 = vmax.f32 %v1225_v18, 0.0  ;;  %v3093_v21 = vld [vmem:[%s3824_s3] sm:$0xff]  }
 0x3c4   : > { %v1278_v25 = vmax.f32 %v1236_v20, 0.0  ;;  %2949 = vmatprep.mubr.msk.bf16.mxu1 %vm743_vm3, %v3093_v21 }
 0x3c5   : > { %v1276_v28 = vmax.f32 %v1228_v23, 0.0 }
 0x3c6   : > { %v1290_v29 = vpack.c.bf16 %v1278_v25, %v1277_v24  ;;  %2914 = vmatpush3.bf16.msra.mxu0 %v1288_v12  ;;  %v3584_v12 = vpop.permute.xlu1 %1442 }
 0x3c7   : > { %v1289_v30 = vpack.c.bf16 %v1276_v28, %v1275_v27  ;;  %v2905_v31 = vpop.f32.mrb[16].mxu1 }
 0x3c8   : > { %v1249_v32 = vadd.f32 %v2905_v31, %v1083_v22  ;;  %v1240_v33 = vpop.f32.mrb[17].mxu1 }
 0x3c9   : > { %v1241_v35 = vadd.f32 %v1240_v33, %v1073_v8  ;;  %v2906_v36 = vpop.f32.mrb[18].mxu1  ;;  %2915 = vmatprep.subr.bf16.mxu0 %v1289_v30  ;;  %v3578_v8 = vpop.permute.xlu0 %1427 }
 0x3ca   : > { %v1252_v37 = vadd.f32 %v2906_v36, %v1088_v26  ;;  %v1243_v38 = vpop.f32.mrb[19].mxu1  ;;  %2916 = vmatpush3.bf16.msra.mxu0 %v1289_v30  ;;  %v1281_v41 = vmax.f32 %v1249_v32, 0.0  ;;  %v3588_v14 = vpop.permute.xlu1 %1452 }
 0x3cb   : > { %v1244_v40 = vadd.f32 %v1243_v38, %v1078_v13  ;;  %2917 = vmatprep.subr.bf16.mxu0 %v1290_v29  ;;  %v1279_v43 = vmax.f32 %v1241_v35, 0.0 }
 0x3cc   : > { %v1282_v42 = vmax.f32 %v1252_v37, 0.0 }
 0x3cd   : > { %v1280_v44 = vmax.f32 %v1244_v40, 0.0  ;;  %v3582_v11 = vpop.permute.xlu0 %1437 }
 0x3ce   : > { %v1292_v45 = vpack.c.bf16 %v1282_v42, %v1281_v41  ;;  %2918 = vmatpush3.bf16.msra.mxu0 %v1290_v29  ;;  %v3592_v16 = vpop.permute.xlu1 %1595 }
 0x3cf   : > { %v1291_v47 = vpack.c.bf16 %v1280_v44, %v1279_v43  ;;  %v2909_v48 = vpop.f32.mrb[20].mxu1 }
 0x3d0   : > { %v1265_v49 = vadd.f32 %v2909_v48, %v1103_v46  ;;  %v1256_v50 = vpop.f32.mrb[21].mxu1 }
 0x3d1   : > { %v1257_v52 = vadd.f32 %v1256_v50, %v1093_v34  ;;  %v2910_v53 = vpop.f32.mrb[22].mxu1  ;;  %2919 = vmatprep.subr.bf16.mxu0 %v1291_v47  ;;  %v3586_v13 = vpop.permute.xlu0 %1447 }
 0x3d2   : > { %v1268_v54 = vadd.f32 %v2910_v53, %v1108_v51  ;;  %v1259_v55 = vpop.f32.mrb[23].mxu1  ;;  %2920 = vmatpush3.bf16.msra.mxu0 %v1291_v47  ;;  %v1285_v58 = vmax.f32 %v1265_v49, 0.0  ;;  %v3596_v18 = vpop.permute.xlu1 %1605 }
 0x3d3   : > { %v1260_v56 = vadd.f32 %v1259_v55, %v1098_v39  ;;  %2921 = vmatprep.subr.bf16.mxu0 %v1292_v45  ;;  %v1283_v60 = vmax.f32 %v1257_v52, 0.0 }
 0x3d4   : > { %v1286_v59 = vmax.f32 %v1268_v54, 0.0 }
 0x3d5   : > { %v1284_v61 = vmax.f32 %v1260_v56, 0.0  ;;  %v3590_v15 = vpop.permute.xlu0 %1590 }
 0x3d6   : > { %v1294_v62 = vpack.c.bf16 %v1286_v59, %v1285_v58  ;;  %2922 = vmatpush3.bf16.msra.mxu0 %v1292_v45  ;;  %v3600_v20 = vpop.permute.xlu1 %1615 }
 0x3d7   : > { %v1293_v0 = vpack.c.bf16 %v1284_v61, %v1283_v60 }
 0x3d9   : > { %2923 = vmatprep.subr.bf16.mxu0 %v1293_v0  ;;  %v3594_v17 = vpop.permute.xlu0 %1600 }
 0x3da   : > { %2924 = vmatpush3.bf16.msra.mxu0 %v1293_v0  ;;  %v3608_v23 = vpop.permute.xlu1 %1625 }
 0x3db   : > { %2925 = vmatprep.subr.bf16.mxu0 %v1294_v62 }
 0x3dd   : > { %v3598_v19 = vpop.permute.xlu0 %1610 }
 0x3de   : > { %2926 = vmatpush3.bf16.msra.mxu0 %v1294_v62  ;;  %v3612_v25 = vpop.permute.xlu1 %1761 }
 0x3df   : > { %2931 = vmatprep.subr.bf16.mxu0 %v1493_v1 }
 0x3e1   : > { %2928 = vmatmul.mubr.bf16.vlgmr.msra.gmra.mrb[16].mxu0 %v3088_v2  ;;  %v3605_v22 = vpop.permute.xlu0 %1620 }
 0x3e2   : > { %2932 = vmatpush3.bf16.msra.mxu0 %v1493_v1  ;;  %2933 = vmatprep.mubr.msk.bf16.mxu0 %vm570_vm2, %v3089_v3  ;;  %v3616_v27 = vpop.permute.xlu1 %1771 }
 0x3e5   : > { %v3610_v24 = vpop.permute.xlu0 %1756 }
 0x3e6   : > { %v3620_v29 = vpop.permute.xlu1 %1781 }
 0x3e9   : > { %2934 = vmatmul.mubr.msk.bf16.vlgmr.msra.gmra.mrb[20].mxu0 %vm570_vm2, %v3090_v4  ;;  %v3614_v26 = vpop.permute.xlu0 %1766 }
 0x3ea   : > { %2937 = vmatprep.mubr.msk.bf16.mxu0 %vm570_vm2, %v3091_v10  ;;  %v3624_v31 = vpop.permute.xlu1 %1791 }
 0x3ed   : > { %v3618_v28 = vpop.permute.xlu0 %1776 }
 0x3ee   : > { %v3628_v33 = vpop.permute.xlu1 %1942 }
 0x3f1   : > { %2938 = vmatmul.mubr.msk.bf16.gmra.mrb[24].mxu0 %vm570_vm2, %v3092_v5  ;;  %v3622_v30 = vpop.permute.xlu0 %1786 }
 0x3f2   : > { %v3632_v35 = vpop.permute.xlu1 %1952 }
 0x3f5   : > { %v3626_v32 = vpop.permute.xlu0 %1937 }
 0x3f6   : > { %v3636_v37 = vpop.permute.xlu1 %1962 }
 0x3f9   : > { %v3630_v34 = vpop.permute.xlu0 %1947 }
 0x3fa   : > { %v3640_v39 = vpop.permute.xlu1 %1972 }
 0x3fd   : > { %v3634_v36 = vpop.permute.xlu0 %1957 }
 0x3fe   : > { %v3644_v41 = vpop.permute.xlu1 %1982 }
 0x401   : > { %v3638_v38 = vpop.permute.xlu0 %1967 }
 0x402   : > { %v3648_v43 = vpop.permute.xlu1 %1992 }
 0x405   : > { %v3642_v40 = vpop.permute.xlu0 %1977 }
 0x406   : > { %v3652_v45 = vpop.permute.xlu1 %2002 }
 0x409   : > { %v3646_v42 = vpop.permute.xlu0 %1987 }
 0x40a   : > { %v3656_v47 = vpop.permute.xlu1 %2012 }
 0x40d   : > { %v3650_v44 = vpop.permute.xlu0 %1997 }
 0x40e   : > { %v3660_v49 = vpop.permute.xlu1 %2215 }
 0x411   : > { %v3654_v46 = vpop.permute.xlu0 %2007 }
 0x412   : > { %v3664_v51 = vpop.permute.xlu1 %2225 }
 0x415   : > { %v3658_v48 = vpop.permute.xlu0 %2210 }
 0x416   : > { %v1311_v53 = vpop.permute.xlu1 %1310 }
 0x419   : > { %v3662_v50 = vpop.permute.xlu0 %2220 }
 0x41a   : > { %v1321_v58 = vpop.permute.xlu1 %1320 }
 0x41d   : > { %v1306_v52 = vpop.permute.xlu0 %1305 }
 0x421   : > { %v1316_v54 = vpop.permute.xlu0 %1315 }
 0x4b4   : > { %v2929_v55 = vpop.f32.mrb[16].mxu0 }
 0x4b5   : > { %v1378_v56 = vadd.f32 %v2929_v55, %v1316_v54  ;;  %v1369_v57 = vpop.f32.mrb[17].mxu0 }
 0x4b6   : > { %v1370_v59 = vadd.f32 %v1369_v57, %v1306_v52  ;;  %v2930_v60 = vpop.f32.mrb[18].mxu0 }
 0x4b7   : > { %v1381_v61 = vadd.f32 %v2930_v60, %v1321_v58  ;;  %v1372_v62 = vpop.f32.mrb[19].mxu0  ;;  %v1386_v1 = vmax.f32 %v1378_v56, 0.0 }
 0x4b8   : > { %v1373_v0 = vadd.f32 %v1372_v62, %v1311_v53  ;;  %v1384_v3 = vmax.f32 %v1370_v59, 0.0 }
 0x4b9   : > { %v1387_v2 = vmax.f32 %v1381_v61, 0.0 }
 0x4ba   : > { %v1385_v4 = vmax.f32 %v1373_v0, 0.0 }
 0x4bb   : > { %v1389_v10 = vpack.c.bf16 %v1387_v2, %v1386_v1 }
 0x4bc   : > { %v1388_v5 = vpack.c.bf16 %v1385_v4, %v1384_v3  ;;  %v2935_v21 = vpop.f32.mrb[20].mxu0 }
 0x4bd   : > { %1392 = vst.msk [vmem:[#allocation2 + $0x8] sm:$0xff] %vm1390_vm4, %v1389_v10  ;;  %v1538_v63 = vadd.f32 %v2935_v21, %v3578_v8  ;;  %v1529_v54 = vpop.f32.mrb[21].mxu0 }
 0x4be   : > { %1391 = vst.msk [vmem:[#allocation2] sm:$0xff] %vm1390_vm4, %v1388_v5  ;;  %v1530_v52 = vadd.f32 %v1529_v54, %v3574_v6  ;;  %v2936_v55 = vpop.f32.mrb[22].mxu0 }
 0x4bf   : > { %v1541_v53 = vadd.f32 %v2936_v55, %v3580_v9  ;;  %v1532_v56 = vpop.f32.mrb[23].mxu0  ;;  %v1562_v58 = vmax.f32 %v1538_v63, 0.0 }
 0x4c0   : > { %v1533_v57 = vadd.f32 %v1532_v56, %v3576_v7  ;;  %v1560_v60 = vmax.f32 %v1530_v52, 0.0 }
 0x4c1   : > { %v1563_v59 = vmax.f32 %v1541_v53, 0.0 }
 0x4c2   : > { %v1561_v61 = vmax.f32 %v1533_v57, 0.0 }
 0x4c3   : > { %v1569_v62 = vpack.c.bf16 %v1563_v59, %v1562_v58 }
 0x4c4   : > { %v1568_v0 = vpack.c.bf16 %v1561_v61, %v1560_v60  ;;  %v2939_v1 = vpop.f32.mrb[24].mxu0 }
 0x4c5   : > { %v1554_v8 = vadd.f32 %v2939_v1, %v3586_v13  ;;  %v1545_v2 = vpop.f32.mrb[25].mxu0  ;;  %v3096_v13 = vld [vmem:[%s3824_s3 + $0x18] sm:$0xff]  }
 0x4c6   : > { %v1546_v3 = vadd.f32 %v1545_v2, %v3582_v11  ;;  %v2940_v4 = vpop.f32.mrb[26].mxu0  ;;  %2941 = vmatprep.subr.bf16.mxu1 %v1568_v0  ;;  %v3094_v11 = vld [vmem:[%s3824_s3 + $0x8] sm:$0xff]  }
 0x4c7   : > { %v1557_v6 = vadd.f32 %v2940_v4, %v3588_v14  ;;  %v1548_v9 = vpop.f32.mrb[27].mxu0  ;;  %2942 = vmatpush3.bf16.msra.mxu1 %v1568_v0  ;;  %v1566_v63 = vmax.f32 %v1554_v8, 0.0  ;;  %v3097_v14 = vld [vmem:[%s3825_s4] sm:$0xff]  }
 0x4c8   : > { %v1549_v7 = vadd.f32 %v1548_v9, %v3584_v12  ;;  %2943 = vmatprep.subr.bf16.mxu1 %v1569_v62  ;;  %v1564_v5 = vmax.f32 %v1546_v3, 0.0  ;;  %v3095_v12 = vld [vmem:[%s3824_s3 + $0x10] sm:$0xff]   ;;  %2965 = vmatprep.mubr.msk.bf16.mxu0 %vm743_vm3, %v3097_v14 }
 0x4c9   : > { %v1567_v10 = vmax.f32 %v1557_v6, 0.0 }
 0x4ca   : > { %v1565_v21 = vmax.f32 %v1549_v7, 0.0 }
 0x4cb   : > { %v1571_v54 = vpack.c.bf16 %v1567_v10, %v1566_v63  ;;  %2944 = vmatpush3.bf16.msra.mxu1 %v1569_v62 }
 0x4cc   : > { %v1570_v52 = vpack.c.bf16 %v1565_v21, %v1564_v5 }
 0x4ce   : > { %2945 = vmatprep.subr.bf16.mxu1 %v1570_v52 }
 0x4cf   : > { %2946 = vmatpush3.bf16.msra.mxu1 %v1570_v52 }
 0x4d0   : > { %2947 = vmatprep.subr.bf16.mxu1 %v1571_v54 }
 0x4d3   : > { %2948 = vmatpush3.bf16.msra.mxu1 %v1571_v54 }
 0x4d6   : > { %2950 = vmatmul.mubr.msk.bf16.vlgmr.msra.gmra.mrb[24].mxu1 %vm743_vm3, %v3094_v11 }
 0x4d7   : > { %2953 = vmatprep.mubr.msk.bf16.mxu1 %vm743_vm3, %v3095_v12 }
 0x4de   : > { %2954 = vmatmul.mubr.msk.bf16.gmra.mrb[28].mxu1 %vm743_vm3, %v3096_v13 }
 0x5a9   : > { %v2951_v55 = vpop.f32.mrb[24].mxu1 }
 0x5aa   : > { %v1704_v53 = vadd.f32 %v2951_v55, %v3594_v17  ;;  %v1695_v56 = vpop.f32.mrb[25].mxu1 }
 0x5ab   : > { %v1696_v57 = vadd.f32 %v1695_v56, %v3590_v15  ;;  %v2952_v58 = vpop.f32.mrb[26].mxu1 }
 0x5ac   : > { %v1707_v59 = vadd.f32 %v2952_v58, %v3596_v18  ;;  %v1698_v60 = vpop.f32.mrb[27].mxu1  ;;  %v1728_v62 = vmax.f32 %v1704_v53, 0.0 }
 0x5ad   : > { %v1699_v61 = vadd.f32 %v1698_v60, %v3592_v16  ;;  %v1726_v1 = vmax.f32 %v1696_v57, 0.0 }
 0x5ae   : > { %v1729_v0 = vmax.f32 %v1707_v59, 0.0 }
 0x5af   : > { %v1727_v8 = vmax.f32 %v1699_v61, 0.0 }
 0x5b0   : > { %v1735_v2 = vpack.c.bf16 %v1729_v0, %v1728_v62 }
 0x5b1   : > { %v1734_v3 = vpack.c.bf16 %v1727_v8, %v1726_v1  ;;  %v2955_v4 = vpop.f32.mrb[28].mxu1 }
 0x5b2   : > { %v1720_v6 = vadd.f32 %v2955_v4, %v3605_v22  ;;  %v1711_v9 = vpop.f32.mrb[29].mxu1  ;;  %v3100_v22 = vld [vmem:[%s3825_s4 + $0x18] sm:$0xff]  }
 0x5b3   : > { %v1712_v17 = vadd.f32 %v1711_v9, %v3598_v19  ;;  %v2956_v7 = vpop.f32.mrb[30].mxu1  ;;  %2957 = vmatprep.subr.bf16.mxu0 %v1734_v3  ;;  %v3098_v19 = vld [vmem:[%s3825_s4 + $0x8] sm:$0xff]  }
 0x5b4   : > { %v1723_v15 = vadd.f32 %v2956_v7, %v3608_v23  ;;  %v1714_v18 = vpop.f32.mrb[31].mxu1  ;;  %2958 = vmatpush3.bf16.msra.mxu0 %v1734_v3  ;;  %v1732_v63 = vmax.f32 %v1720_v6, 0.0  ;;  %v3101_v23 = vld [vmem:[%s3826_s5] sm:$0xff]  }
 0x5b5   : > { %v1715_v16 = vadd.f32 %v1714_v18, %v3600_v20  ;;  %2959 = vmatprep.subr.bf16.mxu0 %v1735_v2  ;;  %v1730_v5 = vmax.f32 %v1712_v17, 0.0  ;;  %v3099_v20 = vld [vmem:[%s3825_s4 + $0x10] sm:$0xff]   ;;  %2981 = vmatprep.mubr.msk.bf16.mxu1 %vm743_vm3, %v3101_v23  ;;  %v2296_v18 = vld [vmem:[#allocation2 + $0x8] sm:$0xff] }
 0x5b6   : > { %v1733_v10 = vmax.f32 %v1723_v15, 0.0 }
 0x5b7   : > { %v1731_v21 = vmax.f32 %v1715_v16, 0.0  ;;  %v3104_v16 = vld [vmem:[%s3826_s5 + $0x18] sm:$0xff]  }
 0x5b8   : > { %v1737_v54 = vpack.c.bf16 %v1733_v10, %v1732_v63  ;;  %2960 = vmatpush3.bf16.msra.mxu0 %v1735_v2  ;;  %v3105_v63 = vld [vmem:[%s3826_s5 + $0x20] sm:$0xff]   ;;  %v3106_v10 = vld [vmem:[%s3826_s5 + $0x28] sm:$0xff]  }
 0x5b9   : > { %v1736_v52 = vpack.c.bf16 %v1731_v21, %v1730_v5  ;;  %v3107_v5 = vld [vmem:[%s3826_s5 + $0x30] sm:$0xff]   ;;  %v3108_v21 = vld [vmem:[%s3826_s5 + $0x38] sm:$0xff]  }
 0x5bb   : > { %2961 = vmatprep.subr.bf16.mxu0 %v1736_v52 }
 0x5bc   : > { %2962 = vmatpush3.bf16.msra.mxu0 %v1736_v52 }
 0x5bd   : > { %2963 = vmatprep.subr.bf16.mxu0 %v1737_v54 }
 0x5c0   : > { %2964 = vmatpush3.bf16.msra.mxu0 %v1737_v54  ;;  %v3109_v54 = vld [vmem:[%s3827_s6] sm:$0xff]  }
 0x5c3   : > { %2966 = vmatmul.mubr.msk.bf16.vlgmr.msra.gmra.mrb[28].mxu0 %vm743_vm3, %v3098_v19 }
 0x5c4   : > { %2969 = vmatprep.mubr.msk.bf16.mxu0 %vm743_vm3, %v3099_v20 }
 0x5cb   : > { %2970 = vmatmul.mubr.msk.bf16.gmra.mrb[32].mxu0 %vm743_vm3, %v3100_v22 }
 0x5cc   : > { %3013 = vmatprep.mubr.bf16.mxu0 %v3109_v54 }
 0x696   : > { %v2967_v11 = vpop.f32.mrb[28].mxu0 }
 0x697   : > { %v1869_v12 = vadd.f32 %v2967_v11, %v3614_v26  ;;  %v1860_v13 = vpop.f32.mrb[29].mxu0 }
 0x698   : > { %v1861_v14 = vadd.f32 %v1860_v13, %v3610_v24  ;;  %v2968_v55 = vpop.f32.mrb[30].mxu0 }
 0x699   : > { %v1872_v53 = vadd.f32 %v2968_v55, %v3616_v27  ;;  %v1863_v56 = vpop.f32.mrb[31].mxu0  ;;  %v1893_v58 = vmax.f32 %v1869_v12, 0.0 }
 0x69a   : > { %v1864_v57 = vadd.f32 %v1863_v56, %v3612_v25  ;;  %v1891_v60 = vmax.f32 %v1861_v14, 0.0 }
 0x69b   : > { %v1894_v59 = vmax.f32 %v1872_v53, 0.0 }
 0x69c   : > { %v1892_v61 = vmax.f32 %v1864_v57, 0.0 }
 0x69d   : > { %v1900_v62 = vpack.c.bf16 %v1894_v59, %v1893_v58 }
 0x69e   : > { %v1899_v0 = vpack.c.bf16 %v1892_v61, %v1891_v60  ;;  %v2971_v1 = vpop.f32.mrb[32].mxu0 }
 0x69f   : > { %v1885_v8 = vadd.f32 %v2971_v1, %v3622_v30  ;;  %v1876_v2 = vpop.f32.mrb[33].mxu0  ;;  %v3145_v30 = vmov 0.0  }
 0x6a0   : > { %v1877_v26 = vadd.f32 %v1876_v2, %v3618_v28  ;;  %v2972_v3 = vpop.f32.mrb[34].mxu0  ;;  %2973 = vmatprep.subr.bf16.mxu1 %v1899_v0  ;;  %v3102_v28 = vld [vmem:[%s3826_s5 + $0x8] sm:$0xff]   ;;  %1396 = vst.msk [vmem:[#allocation4] sm:$0xf] %vm1395_vm8, %v3145_v30 }
 0x6a1   : > { %v1888_v24 = vadd.f32 %v2972_v3, %v3624_v31  ;;  %v1879_v27 = vpop.f32.mrb[35].mxu0  ;;  %2974 = vmatpush3.bf16.msra.mxu1 %v1899_v0  ;;  %v1897_v4 = vmax.f32 %v1885_v8, 0.0  ;;  %v2295_v31 = vld [vmem:[#allocation2] sm:$0xff] }
 0x6a2   : > { %v1880_v25 = vadd.f32 %v1879_v27, %v3620_v29  ;;  %2975 = vmatprep.subr.bf16.mxu1 %v1900_v62  ;;  %v1895_v9 = vmax.f32 %v1877_v26, 0.0  ;;  %v3103_v29 = vld [vmem:[%s3826_s5 + $0x10] sm:$0xff]  }
 0x6a3   : > { %v1898_v6 = vmax.f32 %v1888_v24, 0.0 }
 0x6a4   : > { %v1896_v17 = vmax.f32 %v1880_v25, 0.0 }
 0x6a5   : > { %v1902_v7 = vpack.c.bf16 %v1898_v6, %v1897_v4  ;;  %2976 = vmatpush3.bf16.msra.mxu1 %v1900_v62 }
 0x6a6   : > { %v1901_v15 = vpack.c.bf16 %v1896_v17, %v1895_v9 }
 0x6a8   : > { %2977 = vmatprep.subr.bf16.mxu1 %v1901_v15 }
 0x6a9   : > { %2978 = vmatpush3.bf16.msra.mxu1 %v1901_v15 }
 0x6aa   : > { %2979 = vmatprep.subr.bf16.mxu1 %v1902_v7 }
 0x6ad   : > { %2980 = vmatpush3.bf16.msra.mxu1 %v1902_v7 }
 0x6ae   : > { %3017 = vmatprep.subr.bf16.mxu1 %v3145_v30 }
 0x6b0   : > { %2982 = vmatmul.mubr.msk.bf16.vlgmr.msra.gmra.mrb[32].mxu1 %vm743_vm3, %v3102_v28 }
 0x6b1   : > { %3018 = vmatpush3.bf16.msra.mxu1 %v2295_v31  ;;  %2985 = vmatprep.mubr.msk.bf16.mxu1 %vm743_vm3, %v3103_v29 }
 0x6b2   : > { %3019 = vmatprep.subr.bf16.mxu1 %v3145_v30 }
 0x6b5   : > { %3020 = vmatpush3.bf16.msra.mxu1 %v2296_v18 }
 0x6b6   : > { %3031 = vmatprep.subr.mxu1 %v3145_v30 }
 0x6b8   : > { %2986 = vmatmul.mubr.msk.bf16.gmra.mrb[36].mxu1 %vm743_vm3, %v3104_v16 }
 0x6b9   : > { %2989 = vmatprep.mubr.msk.bf16.mxu1 %vm743_vm3, %v3105_v63 }
 0x6c0   : > { %2990 = vmatmul.mubr.msk.bf16.gmra.mrb[40].mxu1 %vm743_vm3, %v3106_v10 }
 0x6c1   : > { %2993 = vmatprep.mubr.msk.bf16.mxu1 %vm743_vm3, %v3107_v5 }
 0x6c8   : > { %2994 = vmatmul.mubr.msk.bf16.gmra.mrb[44].mxu1 %vm743_vm3, %v3108_v21 }
 0x6c9   : > { %3021 = vmatprep.mubr.msk.bf16.mxu1 %vm3146_vm5, %v3145_v30 }
 0x783   : > { %v2983_v52 = vpop.f32.mrb[32].mxu1 }
 0x784   : > { %v2122_v19 = vadd.f32 %v2983_v52, %v3630_v34  ;;  %v2113_v20 = vpop.f32.mrb[33].mxu1 }
 0x785   : > { %v2114_v22 = vadd.f32 %v2113_v20, %v3626_v32  ;;  %v2984_v23 = vpop.f32.mrb[34].mxu1 }
 0x786   : > { %v2125_v11 = vadd.f32 %v2984_v23, %v3632_v35  ;;  %v2116_v12 = vpop.f32.mrb[35].mxu1  ;;  %v2178_v14 = vmax.f32 %v2122_v19, 0.0 }
 0x787   : > { %v2117_v13 = vadd.f32 %v2116_v12, %v3628_v33  ;;  %v2176_v53 = vmax.f32 %v2114_v22, 0.0 }
 0x788   : > { %v2179_v55 = vmax.f32 %v2125_v11, 0.0 }
 0x789   : > { %v2177_v56 = vmax.f32 %v2117_v13, 0.0 }
 0x78a   : > { %v2193_v57 = vpack.c.bf16 %v2179_v55, %v2178_v14 }
 0x78b   : > { %v2192_v58 = vpack.c.bf16 %v2177_v56, %v2176_v53  ;;  %v2987_v59 = vpop.f32.mrb[36].mxu1 }
 0x78c   : > { %v2138_v60 = vadd.f32 %v2987_v59, %v3638_v38  ;;  %v2129_v61 = vpop.f32.mrb[37].mxu1 }
 0x78d   : > { %v2130_v34 = vadd.f32 %v2129_v61, %v3634_v36  ;;  %v2988_v62 = vpop.f32.mrb[38].mxu1  ;;  %2997 = vmatprep.subr.bf16.mxu0 %v2192_v58 }
 0x78e   : > { %v2141_v32 = vadd.f32 %v2988_v62, %v3640_v39  ;;  %v2132_v35 = vpop.f32.mrb[39].mxu1  ;;  %2998 = vmatpush3.bf16.msra.mxu0 %v2192_v58  ;;  %v2182_v0 = vmax.f32 %v2138_v60, 0.0 }
 0x78f   : > { %v2133_v33 = vadd.f32 %v2132_v35, %v3636_v37  ;;  %2999 = vmatprep.subr.bf16.mxu0 %v2193_v57  ;;  %v2180_v8 = vmax.f32 %v2130_v34, 0.0 }
 0x790   : > { %v2183_v1 = vmax.f32 %v2141_v32, 0.0  ;;  %v2374_v32 = vlaneseq }
 0x791   : > { %v2181_v2 = vmax.f32 %v2133_v33, 0.0 }
 0x792   : > { %v2195_v26 = vpack.c.bf16 %v2183_v1, %v2182_v0  ;;  %3000 = vmatpush3.bf16.msra.mxu0 %v2193_v57  ;;  %v2375_v0 = vshrl.u32 %v2374_v32, 7 }
 0x793   : > { %v2194_v3 = vpack.c.bf16 %v2181_v2, %v2180_v8  ;;  %v2991_v38 = vpop.f32.mrb[40].mxu1 }
 0x794   : > { %v2154_v24 = vadd.f32 %v2991_v38, %v3646_v42  ;;  %v2145_v36 = vpop.f32.mrb[41].mxu1 }
 0x795   : > { %v2146_v27 = vadd.f32 %v2145_v36, %v3642_v40  ;;  %v2992_v25 = vpop.f32.mrb[42].mxu1  ;;  %3001 = vmatprep.subr.bf16.mxu0 %v2194_v3 }
 0x796   : > { %v2157_v39 = vadd.f32 %v2992_v25, %v3648_v43  ;;  %v2148_v4 = vpop.f32.mrb[43].mxu1  ;;  %3002 = vmatpush3.bf16.msra.mxu0 %v2194_v3  ;;  %v2186_v6 = vmax.f32 %v2154_v24, 0.0 }
 0x797   : > { %v2149_v37 = vadd.f32 %v2148_v4, %v3644_v41  ;;  %3003 = vmatprep.subr.bf16.mxu0 %v2195_v26  ;;  %v2184_v17 = vmax.f32 %v2146_v27, 0.0 }
 0x798   : > { %v2187_v9 = vmax.f32 %v2157_v39, 0.0 }
 0x799   : > { %v2185_v7 = vmax.f32 %v2149_v37, 0.0 }
 0x79a   : > { %v2197_v15 = vpack.c.bf16 %v2187_v9, %v2186_v6  ;;  %3004 = vmatpush3.bf16.msra.mxu0 %v2195_v26  ;;  %v2376_v26 = vsub.s32 0, %v2375_v0 }
 0x79b   : > { %v2196_v28 = vpack.c.bf16 %v2185_v7, %v2184_v17  ;;  %v2995_v42 = vpop.f32.mrb[44].mxu1  ;;  %v3837_v7 = vld [vmem:[#allocation5_spill] sm:$0xff] }
 0x79c   : > { %v2170_v29 = vadd.f32 %v2995_v42, %v3654_v46  ;;  %v2161_v40 = vpop.f32.mrb[45].mxu1  ;;  %v2428_v42 = vld [vmem:[#allocation4] sm:$0xf] }
 0x79d   : > { %v2162_v31 = vadd.f32 %v2161_v40, %v3650_v44  ;;  %v2996_v18 = vpop.f32.mrb[46].mxu1  ;;  %3005 = vmatprep.subr.bf16.mxu0 %v2196_v28  ;;  %v3110_v44 = vld [vmem:[%s3827_s6 + $0x8] sm:$0xff]  }
 0x79e   : > { %v2173_v43 = vadd.f32 %v2996_v18, %v3656_v47  ;;  %v2164_v16 = vpop.f32.mrb[47].mxu1  ;;  %3006 = vmatpush3.bf16.msra.mxu0 %v2196_v28  ;;  %v2190_v63 = vmax.f32 %v2170_v29, 0.0 }
 0x79f   : > { %v2165_v41 = vadd.f32 %v2164_v16, %v3652_v45  ;;  %3007 = vmatprep.subr.bf16.mxu0 %v2197_v15  ;;  %v2188_v5 = vmax.f32 %v2162_v31, 0.0 }
 0x7a0   : > { %v2191_v10 = vmax.f32 %v2173_v43, 0.0 }
 0x7a1   : > { %v2189_v21 = vmax.f32 %v2165_v41, 0.0 }
 0x7a2   : > { %v2199_v54 = vpack.c.bf16 %v2191_v10, %v2190_v63  ;;  %3008 = vmatpush3.bf16.msra.mxu0 %v2197_v15  ;;  %v2453_v15 = vld [vmem:[%s3267_s29] sm:$0x7]  ;;  %v2448_v63 = vsub.s32 3, %v2375_v0 }
 0x7a3   : > { %v2198_v52 = vpack.c.bf16 %v2189_v21, %v2188_v5  ;;  %v2454_v28 = vsel %vm2451_vm9, %v2453_v15, 0.0 }
 0x7a5   : > { %3009 = vmatprep.subr.bf16.mxu0 %v2198_v52 }
 0x7a6   : > { %3010 = vmatpush3.bf16.msra.mxu0 %v2198_v52 }
 0x7a7   : > { %3011 = vmatprep.subr.bf16.mxu0 %v2199_v54 }
 0x7aa   : > { %3012 = vmatpush3.bf16.msra.mxu0 %v2199_v54 }
 0x7ab   : > { %3025 = vmatprep.subr.bf16.mxu0 %v3145_v30 }
 0x7ad   : > { %3014 = vmatmul.mubr.bf16.vlgmr.msra.gmra.mrb[36].mxu0 %v3110_v44 }
 0x7ae   : > { %3027 = vmatprep.mubr.msk.bf16.mxu0 %vm3146_vm5, %v3145_v30 }
 0x880   : > { %v3015_v45 = vpop.f32.mrb[36].mxu0 }
 0x881   : > { %v2283_v46 = vadd.f32 %v3015_v45, %v3662_v50  ;;  %v2274_v47 = vpop.f32.mrb[37].mxu0 }
 0x882   : > { %v2275_v19 = vadd.f32 %v2274_v47, %v3658_v48  ;;  %v3016_v20 = vpop.f32.mrb[38].mxu0  ;;  %v3147_v48 = vmov -inf  }
 0x883   : > { %v2286_v22 = vadd.f32 %v3016_v20, %v3664_v51  ;;  %v2277_v23 = vpop.f32.mrb[39].mxu0  ;;  %v2291_v12 = vmax.f32 %v2283_v46, 0.0  ;;  %1394 = vst.msk [vmem:[#allocation3] sm:$0x1] %vm1393_vm7, %v3147_v48 }
 0x884   : > { %v2278_v11 = vadd.f32 %v2277_v23, %v3660_v49  ;;  %v2289_v14 = vmax.f32 %v2275_v19, 0.0 }
 0x885   : > { %v2292_v13 = vmax.f32 %v2286_v22, 0.0 }
 0x886   : > { %v2290_v55 = vmax.f32 %v2278_v11, 0.0 }
 0x887   : > { %v2294_v53 = vpack.c.bf16 %v2292_v13, %v2291_v12 }
 0x888   : > { %v2293_v56 = vpack.c.bf16 %v2290_v55, %v2289_v14 }
 0x88a   : > { %2297 = vxpose.xlu0.c.b16.start [1/2] (short) (narrow) %v2293_v56, 16  ;;  %v2368_v8 = vld [vmem:[#allocation3] sm:$0x1] }
 0x88e   : > { %2298 = vxpose.xlu0.c.b16.end [2/2] (short) (narrow) %v2294_v53, 16 }
 0x89b   : > { %2455 = vadd.xlane.f32.xlu0 %v2454_v28 }
 0x8f0   : > { %v2305_v57 = vpop.trf.xlu0 }
 0x8f1   : > { %3022 = vmatmul.mubr.msk.bf16.vlgmr.msra.gmra.mrb[48].mxu1 %vm2313_vm6, %v2305_v57 }
 0x8f2   : > { %3033 = vmatprep.mubr.msk.f32.mxu1 %vm3146_vm5, %v3145_v30 }
 0x928   : > { %v2456_v52 = vpop.xlane.xlu0 %2455 }
 0x929   : > { %v2458_v45 = vmul.f32 0.0625, %v2456_v52 }
 0x92b   : > { %v2463_v19 = vsub.f32 %v2453_v15, %v2458_v45 }
 0x9c4   : > { %v2351_v49 = vpop.f32.mrb[48].mxu1 }
 0x9c5   : > { %v3023_v50 = vpop.f32.mrb[49].mxu1  ;;  %v2359_v58 = vsel %vm1390_vm4, %v2351_v49, -inf }
 0x9c6   : > { %v2354_v51 = vpop.f32.mrb[50].mxu1 }
 0x9c7   : > { %v2360_v59 = vsel %vm1390_vm4, %v2354_v51, -inf  ;;  %v3024_v60 = vpop.f32.mrb[51].mxu1 }
 0x9c8   : > { %v2361_v61 = vmax.f32 %v2359_v58, %v2360_v59 }
 0x9ca   : > { %v2362_v34 = vrot.slane %v2361_v61, 4 }
 0x9cc   : > { %v2363_v62 = vmax.f32 %v2361_v61, %v2362_v34 }
 0x9ce   : > { %v2364_v35 = vrot.slane %v2363_v62, 2 }
 0x9d0   : > { %v2365_v33 = vmax.f32 %v2363_v62, %v2364_v35 }
 0x9d2   : > { %v2366_v1 = vrot.slane %v2365_v33, 1 }
 0x9d4   : > { %v2367_v2 = vmax.f32 %v2365_v33, %v2366_v1 }
 0x9d6   : > { %v2369_v30 = vmax.f32 %v2368_v8, %v2367_v2 }
 0x9d8   : > { %v2370_v3 = vsub.f32 %v2368_v8, %v2369_v30  ;;  %v2377_v38 = vrot.slane %v2369_v30, %v2376_v26  ;;  %2440 = vst.msk [vmem:[#allocation3] sm:$0x1] %vm1393_vm7, %v2369_v30 }
 0x9da   : > { %v2371_v24 = vmul.f32 1.442695, %v2370_v3  ;;  %v2379_v36 = vsub.f32 %v2351_v49, %v2377_v38  ;;  %v2380_v27 = vsub.f32 %v2354_v51, %v2377_v38 }
 0x9dc   : > { %3111 = vpow2.f32 %v2371_v24  ;;  %v2381_v25 = vmul.f32 1.442695, %v2379_v36  ;;  %v2383_v39 = vmul.f32 1.442695, %v2380_v27 }
 0x9de   : > { %3113 = vpow2.f32 %v2381_v25 }
 0x9df   : > { %3115 = vpow2.f32 %v2383_v39 }
 0x9e6   : > { %v3112_v4 = vpop.eup %3111 }
 0x9e7   : > { %v2433_v37 = vrot.slane %v3112_v4, %v2376_v26 }
 0x9e8   : > { %v3114_v6 = vpop.eup %3113 }
 0x9e9   : > { %v3116_v9 = vpop.eup %3115  ;;  %v2435_v29 = vmul.f32 %v2433_v37, %v2428_v42 }
 0x9ea   : > { %v2385_v17 = vpack.c.bf16 %v3116_v9, %v3114_v6 }
 0x9ec   : > { %3026 = vmatpush3.bf16.msra.mxu0 %v2385_v17 }
 0x9ef   : > { %3028 = vmatmul.mubr.msk.bf16.vlgmr.msra.gmra.mrb[40].mxu0 %vm1390_vm4, %v3837_v7 }
 0xac2   : > { %v2422_v40 = vpop.f32.mrb[40].mxu0 }
 0xac3   : > { %v2436_v31 = vadd.f32 %v2435_v29, %v2422_v40  ;;  %v3029_v18 = vpop.f32.mrb[41].mxu0 }
 0xac4   : > { %v2425_v43 = vpop.f32.mrb[42].mxu0 }
 0xac5   : > { %2438 = vst.msk [vmem:[#allocation4] sm:$0xf] %vm1395_vm8, %v2436_v31  ;;  %v3030_v16 = vpop.f32.mrb[43].mxu0 }
 0xacc   : > { %v2444_v41 = vld [vmem:[#allocation4] sm:$0xf] }
 0xacd   : > { %3117 = vrcp.f32 %v2444_v41 }
 0xad7   : > { %v3118_v10 = vpop.eup %3117 }
 0xad8   : > { %v2449_v5 = vrot.slane %v3118_v10, %v2448_v63 }
 0xada   : > { %v2450_v21 = vmul.f32 %v2449_v5, %v2444_v41 }
 0xadc   : > { %v2459_v54 = vsel %vm2451_vm9, %v2450_v21, 0.0  ;;  %2452 = vst.msk [vmem:[%s482_s25] sm:$0x7] %vm2451_vm9, %v2450_v21 }
 0xadd   : > { %2460 = vadd.xlane.f32.xlu1 %v2459_v54 }
 0xb6a   : > { %v2461_v44 = vpop.xlane.xlu1 %2460 }
 0xb6b   : > { %v2462_v46 = vmul.f32 0.0625, %v2461_v44 }
 0xb6d   : > { %v2464_v47 = vsub.f32 %v2450_v21, %v2462_v46 }
 0xb6f   : > { %3032 = vmatpush3.xpose.msk.msra.mxu1 %vm1390_vm4, %v2464_v47 }
 0xb72   : > { %3034 = vmatmul.mubr.msk.f32.vlgmr.msra.gmra.mrb[52].mxu1 %vm1390_vm4, %v2463_v19 }
 0xc45   : > { %v2537_v20 = vpop.f32.mrb[52].mxu1 }
 0xc46   : > { %v2541_v22 = vsel %vm570_vm2, %v2537_v20, %v2458_v45  ;;  %v3035_v23 = vpop.f32.mrb[53].mxu1 }
 0xc47   : > { %v2543_v11 = vsel %vm2542_vm10, %v2541_v22, %v2462_v46 }
 0xc48   : > { %2545 = vst.msk [vmem:[%s486_s17] sm:$0x7] %vm2544_vm11, %v2543_v11 }
 0xc49 PF: > { %s24_s27 = sadd.s32 1, %s3141_s27   ;;  %s3838_s25 = smov %s3137_s26 }
 0xc4a   : > { %p21_p5 = scmp.ge.s32.totalorder %s24_s27, 4   ;;  %s3839_s26 = smov %s3841_s28 }
 0xc4c   :  { %23 = sbr.rel (!%p21_p5) target bundleno = 2 (0x2), region = 121 }

</bundles_post_ra>
